<compile_context>
chip_gen: v7x
topology: tpu7x:2x2x1
jax: 0.10.0
libtpu: 0.0.40
codegen_flags: <defaults>
</compile_context>

<pallas_src>
import functools

import jax
import jax.numpy as jnp
from jax import lax
from jax.experimental import pallas as pl
from jax.experimental.pallas import tpu as pltpu

F32 = jnp.float32
BF16 = jnp.bfloat16


# ----------------------------------------------------------------------------
# kernel: 3x3 conv (pad=1, stride=1, dilation=1) + bias, one batch per grid step
# ----------------------------------------------------------------------------
def _conv3x3_kernel(x_ref, w_ref, b_ref, o_ref, xpad_ref, *, H, W):
    # x_ref   : (1, H, W, Cin)      f32
    # w_ref   : (9*Cin, Cout)       bf16   rows ordered (ky, kx, ci)
    # b_ref   : (Cout, 1)           f32
    # o_ref   : (1, Cout, H*W)      f32    (NCHW-flattened output tile)
    # xpad_ref: (H+2, W+2, Cin)     f32    VMEM scratch (zero halo)
    Cin = x_ref.shape[3]

    # Zero-pad the halo into VMEM (re-zeroed every step: scratch persists across
    # grid steps and the grid may be split across TensorCores).
    xpad_ref[...] = jnp.zeros(xpad_ref.shape, xpad_ref.dtype)
    xpad_ref[1:H + 1, 1:W + 1, :] = x_ref[0]

    # im2col: one (H*W, 9*Cin) slab; column order (ky, kx, ci) matches w_ref.
    cols = jnp.concatenate(
        [xpad_ref[dy:dy + H, dx:dx + W, :].reshape(H * W, Cin)
         for dy in range(3) for dx in range(3)],
        axis=-1)

    # Single MXU contraction (K = 9*Cin), bf16 operands, f32 accumulation.
    # Result is oriented (Cout, H*W): lane-dense stores + native NCHW order.
    acc = lax.dot_general(
        w_ref[...], cols.astype(BF16),
        dimension_numbers=(((0,), (1,)), ((), ())),
        preferred_element_type=F32)                      # (Cout, H*W)

    o_ref[0] = (acc + b_ref[...]).astype(o_ref.dtype)


# ----------------------------------------------------------------------------
# wrapper: PyTorch-style NCHW / OIHW interface
# ----------------------------------------------------------------------------
def conv3x3_forward(x_nchw, weight_oihw, bias):
    B, Cin, H, W = x_nchw.shape
    Cout = weight_oihw.shape[0]

    # Layout glue (wrapper-side, cheap): NCHW -> NHWC for the kernel input;
    # (Cout, Cin, 3, 3) -> (ky, kx, Cin, Cout) -> (9*Cin, Cout) bf16 weight.
    x_nhwc = jnp.transpose(x_nchw, (0, 2, 3, 1)).astype(F32)
    wmat = (jnp.transpose(weight_oihw, (2, 3, 1, 0))
            .reshape(9 * Cin, Cout).astype(BF16))
    b2d = bias.reshape(Cout, 1).astype(F32)

    out = pl.pallas_call(
        functools.partial(_conv3x3_kernel, H=H, W=W),
        out_shape=jax.ShapeDtypeStruct((B, Cout, H * W), F32),
        grid=(B,),
        in_specs=[
            pl.BlockSpec((1, H, W, Cin), lambda b: (b, 0, 0, 0)),
            pl.BlockSpec((9 * Cin, Cout), lambda b: (0, 0)),
            pl.BlockSpec((Cout, 1), lambda b: (0, 0)),
        ],
        out_specs=pl.BlockSpec((1, Cout, H * W), lambda b: (b, 0, 0)),
        scratch_shapes=[pltpu.VMEM((H + 2, W + 2, Cin), F32)],
        compiler_params=pltpu.CompilerParams(
            dimension_semantics=("parallel",),
            vmem_limit_bytes=32 * 1024 * 1024),
    )(x_nhwc, wmat, b2d)

    # (B, Cout, H*W) is already NCHW-ordered; only a free leading-dim reshape.
    return out.reshape(B, Cout, H, W)


# ----------------------------------------------------------------------------
# demo / self-check
# ----------------------------------------------------------------------------
if __name__ == "__main__":
    B, Cin, Cout, H, W = 2, 4, 8, 16, 16          # x: (B, C, H, W)
    key = jax.random.PRNGKey(0)
    kx, kw, kb = jax.random.split(key, 3)

    x = jax.random.normal(kx, (B, Cin, H, W), F32)
    bound = 1.0 / (Cin * 9) ** 0.5                # PyTorch Conv2d default init range
    weight = jax.random.uniform(kw, (Cout, Cin, 3, 3), F32, -bound, bound)
    bias = jax.random.uniform(kb, (Cout,), F32, -bound, bound)

    fwd = jax.jit(conv3x3_forward)
    out = jax.block_until_ready(fwd(x, weight, bias))
    assert out.shape == (B, Cout, H, W)
    assert bool(jnp.all(jnp.isfinite(out)))

    # pure-JAX f32 reference (bf16 MXU operands -> loose-ish tolerance)
    ref = lax.conv_general_dilated(
        x, weight, window_strides=(1, 1), padding=((1, 1), (1, 1)),
        dimension_numbers=("NCHW", "OIHW", "NCHW")) + bias[None, :, None, None]
    max_err = float(jnp.max(jnp.abs(out - ref)))
    assert bool(jnp.allclose(out, ref, atol=5e-2, rtol=5e-2)), max_err

    print("KERNEL_OK")
</pallas_src>

<mosaic_0001>
module attributes {stable_mosaic.version = 11 : i64} {
  func.func @_conv3x3_kernel(%arg0: i32, %arg1: memref<1x16x16x4xf32, #tpu.memory_space<vmem>>, %arg2: memref<36x8xbf16, #tpu.memory_space<vmem>>, %arg3: memref<8x1xf32, #tpu.memory_space<vmem>>, %arg4: memref<1x8x256xf32, #tpu.memory_space<vmem>>, %arg5: memref<18x18x4xf32, #tpu.memory_space<vmem>>) attributes {dimension_semantics = [#tpu.dimension_semantics<parallel>], iteration_bounds = array<i64: 2>, scalar_prefetch = 0 : i64, scratch_operands = 1 : i64, tpu.core_type = #tpu.core_type<tc>, window_params = [{transform_indices = @transform_0, window_bounds = array<i64: 1, 16, 16, 4>}, {pipeline_mode = #tpu.pipeline_mode<synchronous>, transform_indices = @transform_1, window_bounds = array<i64: 36, 8>}, {pipeline_mode = #tpu.pipeline_mode<synchronous>, transform_indices = @transform_2, window_bounds = array<i64: 8, 1>}, {transform_indices = @transform_3, window_bounds = array<i64: 1, 8, 256>}]} {
    %cst = arith.constant 0.000000e+00 : f32
    %0 = vector.broadcast %cst : f32 to vector<18x18x4xf32>
    %c0 = arith.constant 0 : index
    %c0_0 = arith.constant 0 : index
    %c0_1 = arith.constant 0 : index
    %1 = vector.load %arg5[%c0, %c0_0, %c0_1] : memref<18x18x4xf32, #tpu.memory_space<vmem>>, vector<18x18x4xf32>
    tpu.vector_store %arg5[%c0, %c0_0, %c0_1], %0 {strides = array<i32>} : memref<18x18x4xf32, #tpu.memory_space<vmem>>, vector<18x18x4xf32>,
    %c0_2 = arith.constant 0 : index
    %c0_3 = arith.constant 0 : index
    %c0_4 = arith.constant 0 : index
    %c0_5 = arith.constant 0 : index
    %2 = vector.load %arg1[%c0_2, %c0_3, %c0_4, %c0_5] : memref<1x16x16x4xf32, #tpu.memory_space<vmem>>, vector<1x16x16x4xf32>
    %3 = vector.shape_cast %2 : vector<1x16x16x4xf32> to vector<16x16x4xf32>
    %c1 = arith.constant 1 : index
    %c1_6 = arith.constant 1 : index
    %c0_7 = arith.constant 0 : index
    %4 = vector.load %arg5[%c1, %c1_6, %c0_7] : memref<18x18x4xf32, #tpu.memory_space<vmem>>, vector<16x16x4xf32>
    tpu.vector_store %arg5[%c1, %c1_6, %c0_7], %3 {strides = array<i32>} : memref<18x18x4xf32, #tpu.memory_space<vmem>>, vector<16x16x4xf32>,
    %c0_8 = arith.constant 0 : index
    %c0_9 = arith.constant 0 : index
    %c0_10 = arith.constant 0 : index
    %5 = vector.load %arg5[%c0_8, %c0_9, %c0_10] : memref<18x18x4xf32, #tpu.memory_space<vmem>>, vector<16x16x4xf32>
    %6 = vector.shape_cast %5 : vector<16x16x4xf32> to vector<256x4xf32>
    %c0_11 = arith.constant 0 : index
    %c1_12 = arith.constant 1 : index
    %c0_13 = arith.constant 0 : index
    %7 = vector.load %arg5[%c0_11, %c1_12, %c0_13] : memref<18x18x4xf32, #tpu.memory_space<vmem>>, vector<16x16x4xf32>
    %8 = vector.shape_cast %7 : vector<16x16x4xf32> to vector<256x4xf32>
    %c0_14 = arith.constant 0 : index
    %c2 = arith.constant 2 : index
    %c0_15 = arith.constant 0 : index
    %9 = vector.load %arg5[%c0_14, %c2, %c0_15] : memref<18x18x4xf32, #tpu.memory_space<vmem>>, vector<16x16x4xf32>
    %10 = vector.shape_cast %9 : vector<16x16x4xf32> to vector<256x4xf32>
    %c1_16 = arith.constant 1 : index
    %c0_17 = arith.constant 0 : index
    %c0_18 = arith.constant 0 : index
    %11 = vector.load %arg5[%c1_16, %c0_17, %c0_18] : memref<18x18x4xf32, #tpu.memory_space<vmem>>, vector<16x16x4xf32>
    %12 = vector.shape_cast %11 : vector<16x16x4xf32> to vector<256x4xf32>
    %c1_19 = arith.constant 1 : index
    %c1_20 = arith.constant 1 : index
    %c0_21 = arith.constant 0 : index
    %13 = vector.load %arg5[%c1_19, %c1_20, %c0_21] : memref<18x18x4xf32, #tpu.memory_space<vmem>>, vector<16x16x4xf32>
    %14 = vector.shape_cast %13 : vector<16x16x4xf32> to vector<256x4xf32>
    %c1_22 = arith.constant 1 : index
    %c2_23 = arith.constant 2 : index
    %c0_24 = arith.constant 0 : index
    %15 = vector.load %arg5[%c1_22, %c2_23, %c0_24] : memref<18x18x4xf32, #tpu.memory_space<vmem>>, vector<16x16x4xf32>
    %16 = vector.shape_cast %15 : vector<16x16x4xf32> to vector<256x4xf32>
    %c2_25 = arith.constant 2 : index
    %c0_26 = arith.constant 0 : index
    %c0_27 = arith.constant 0 : index
    %17 = vector.load %arg5[%c2_25, %c0_26, %c0_27] : memref<18x18x4xf32, #tpu.memory_space<vmem>>, vector<16x16x4xf32>
    %18 = vector.shape_cast %17 : vector<16x16x4xf32> to vector<256x4xf32>
    %c2_28 = arith.constant 2 : index
    %c1_29 = arith.constant 1 : index
    %c0_30 = arith.constant 0 : index
    %19 = vector.load %arg5[%c2_28, %c1_29, %c0_30] : memref<18x18x4xf32, #tpu.memory_space<vmem>>, vector<16x16x4xf32>
    %20 = vector.shape_cast %19 : vector<16x16x4xf32> to vector<256x4xf32>
    %c2_31 = arith.constant 2 : index
    %c2_32 = arith.constant 2 : index
    %c0_33 = arith.constant 0 : index
    %21 = vector.load %arg5[%c2_31, %c2_32, %c0_33] : memref<18x18x4xf32, #tpu.memory_space<vmem>>, vector<16x16x4xf32>
    %22 = vector.shape_cast %21 : vector<16x16x4xf32> to vector<256x4xf32>
    %23 = tpu.concatenate %6, %8, %10, %12, %14, %16, %18, %20, %22 in 1 : vector<256x4xf32>, vector<256x4xf32>, vector<256x4xf32>, vector<256x4xf32>, vector<256x4xf32>, vector<256x4xf32>, vector<256x4xf32>, vector<256x4xf32>, vector<256x4xf32> -> vector<256x36xf32>
    %c0_34 = arith.constant 0 : index
    %c0_35 = arith.constant 0 : index
    %24 = vector.load %arg2[%c0_34, %c0_35] : memref<36x8xbf16, #tpu.memory_space<vmem>>, vector<36x8xbf16>
    %25 = arith.truncf %23 : vector<256x36xf32> to vector<256x36xbf16>
    %cst_36 = arith.constant dense<0.000000e+00> : vector<8x256xf32>
    %26 = tpu.matmul %24, %25, %cst_36 {dimension_numbers = #tpu.dot_dimension_numbers<[0], [1], [1], [0], [0, 1, 1, 0], [], []>} : vector<36x8xbf16>, vector<256x36xbf16>, vector<8x256xf32> -> vector<8x256xf32>
    %c0_37 = arith.constant 0 : index
    %c0_38 = arith.constant 0 : index
    %27 = vector.load %arg3[%c0_37, %c0_38] : memref<8x1xf32, #tpu.memory_space<vmem>>, vector<8x1xf32>
    %28 = vector.broadcast %27 : vector<8x1xf32> to vector<8x256xf32>
    %29 = arith.addf %26, %28 : vector<8x256xf32>
    %c0_39 = arith.constant 0 : index
    %c0_40 = arith.constant 0 : index
    %c0_41 = arith.constant 0 : index
    %30 = vector.load %arg4[%c0_39, %c0_40, %c0_41] : memref<1x8x256xf32, #tpu.memory_space<vmem>>, vector<1x8x256xf32>
    %31 = vector.shape_cast %30 : vector<1x8x256xf32> to vector<8x256xf32>
    %32 = vector.shape_cast %29 : vector<8x256xf32> to vector<1x8x256xf32>
    tpu.vector_store %arg4[%c0_39, %c0_40, %c0_41], %32 {strides = array<i32>} : memref<1x8x256xf32, #tpu.memory_space<vmem>>, vector<1x8x256xf32>,
    return
  }
  func.func @transform_0(%arg0: i32) -> (i32, i32, i32, i32) {
    %c0_i32 = arith.constant 0 : i32
    %c0_i32_0 = arith.constant 0 : i32
    %c0_i32_1 = arith.constant 0 : i32
    %c0_i32_2 = arith.constant 0 : i32
    return %arg0, %c0_i32, %c0_i32_0, %c0_i32_1 : i32, i32, i32, i32
  }
  func.func @transform_1(%arg0: i32) -> (i32, i32) {
    %c0_i32 = arith.constant 0 : i32
    %c0_i32_0 = arith.constant 0 : i32
    %c0_i32_1 = arith.constant 0 : i32
    return %c0_i32, %c0_i32_0 : i32, i32
  }
  func.func @transform_2(%arg0: i32) -> (i32, i32) {
    %c0_i32 = arith.constant 0 : i32
    %c0_i32_0 = arith.constant 0 : i32
    %c0_i32_1 = arith.constant 0 : i32
    return %c0_i32, %c0_i32_0 : i32, i32
  }
  func.func @transform_3(%arg0: i32) -> (i32, i32, i32) {
    %c0_i32 = arith.constant 0 : i32
    %c0_i32_0 = arith.constant 0 : i32
    %c0_i32_1 = arith.constant 0 : i32
    return %arg0, %c0_i32, %c0_i32_0 : i32, i32, i32
  }
}

</mosaic_0001>

<bundles_post_ra>
// kernel: conv3x3_forward.1
= control target key start
LH: loop header
LB: loop body
LE: loop exit
PB: predicated region body
PF: predicated region fallthrough
CT: control target
= control target key end

     0   :  { %s2830_s12 = smov 0   ;;  %s3945_s0 = inlined_call_operand.vmem [shape: f32[2,16,16,4], index: 0, kind: input, shape index: {}]   ;;  %s3946_s1 = inlined_call_operand.vmem [shape: bf16[36,8], index: 1, kind: input, shape index: {}]   ;;  %s3947_s2 = inlined_call_operand.vmem [shape: f32[8,1], index: 2, kind: input, shape index: {}]   ;;  %s3948_s3 = inlined_call_operand.vmem [shape: f32[2,8,256], index: 3, kind: output, shape index: {}]  }
   0x1 LB: > { %s2078_s13 = sadd.s32 4294967295, %s2798_s12   ;;  %p2082_p0 = scmp.ge.s32.totalorder %s2798_s12, 1  ;;  %s2798_s12 = sphi %s2830_s12, %s13_s12  }
   0x2   : > { %p137_p1 = scmp.lt.s32.totalorder %s2798_s12, 3 }
   0x4   : > { %p138_p2 = pnand %p2082_p0, %p137_p1 }
   0x6   : > { %141 = sbr.rel (%p138_p2) target bundleno = 650 (0x28a), region = 32 }
   0xd   : > { %vm172_vm0 = vcmask 31744   ;;  %vm175_vm1 = vcmask 25600   ;;  %p2840_p3 = scmp.lt.s32.totalorder %s2078_s13, 1  ;;  %v2800_v0 = vmov 0.0   ;;  %s2801_s19 = smov 4   ;;  %vm1638_vm2 = vcmask 64512  }
   0xe   : > { %173 = vst.msk [vmem:[#allocation2] sm:$0xff] %vm172_vm0, %v2800_v0  ;;  %174 = vst.msk [vmem:[#allocation2 + $0x8] sm:$0xff] %vm172_vm0, %v2800_v0  ;;  %s2802_s20 = smov 8   ;;  %s2803_s21 = smov 12   ;;  %vm1671_vm3 = vcmask 97280   ;;  %vm1704_vm4 = vcmask 130048  }
   0xf   : > { %176 = vst.msk [vmem:[#allocation2 + $0x10] sm:$0x3] %vm175_vm1, %v2800_v0  ;;  %179 = vst.msk [vmem:[#allocation2 + $0x28] sm:$0x3] %vm175_vm1, %v2800_v0  ;;  %s3999_s13 = smov (!%p2840_p3, %s2078_s13), 1  ;;  %s2804_s22 = smov 16  }
  0x10   : > { %177 = vst.msk [vmem:[#allocation2 + $0x18] sm:$0xff] %vm172_vm0, %v2800_v0  ;;  %178 = vst.msk [vmem:[#allocation2 + $0x20] sm:$0xff] %vm172_vm0, %v2800_v0  ;;  %s2093_s15 = sshll.u32 %s3999_s13, 8  ;;  %s2805_s23 = smov 20   ;;  %vm1737_vm5 = vcmask 162816   ;;  %vm1770_vm6 = vcmask 195584  }
  0x11   : > { %180 = vst.msk [vmem:[#allocation2 + $0x30] sm:$0xff] %vm172_vm0, %v2800_v0  ;;  %181 = vst.msk [vmem:[#allocation2 + $0x38] sm:$0xff] %vm172_vm0, %v2800_v0  ;;  %s2908_s18 = scalar_lea.vmem %s3945_s0, %s2093_s15  ;;  %s2806_s24 = smov 24   ;;  %vm1803_vm7 = vcmask 228352   ;;  %vm1836_vm8 = vcmask 261120   ;;  %vm1928_vm9 = vcmask 293888  }
  0x12   : > { %182 = vst.msk [vmem:[#allocation2 + $0x40] sm:$0x3] %vm175_vm1, %v2800_v0  ;;  %185 = vst.msk [vmem:[#allocation2 + $0x58] sm:$0x3] %vm175_vm1, %v2800_v0  ;;  %v230_v1 = vld [vmem:[%s2908_s18 + $0x10] sm:$0xff]  ;;  %v231_v2 = vld [vmem:[%s2908_s18 + $0x18] sm:$0xff] }
  0x13   : > { %183 = vst.msk [vmem:[#allocation2 + $0x48] sm:$0xff] %vm172_vm0, %v2800_v0  ;;  %184 = vst.msk [vmem:[#allocation2 + $0x50] sm:$0xff] %vm172_vm0, %v2800_v0  ;;  %v228_v3 = vld [vmem:[%s2908_s18] sm:$0xff]  ;;  %v229_v4 = vld [vmem:[%s2908_s18 + $0x8] sm:$0xff]  ;;  %s2807_s25 = smov 28   ;;  %s2808_s26 = smov 32  }
  0x14   : > { %186 = vst.msk [vmem:[#allocation2 + $0x60] sm:$0xff] %vm172_vm0, %v2800_v0  ;;  %187 = vst.msk [vmem:[#allocation2 + $0x68] sm:$0xff] %vm172_vm0, %v2800_v0  ;;  %v232_v5 = vld [vmem:[%s2908_s18 + $0x20] sm:$0xff]  ;;  %v233_v6 = vld [vmem:[%s2908_s18 + $0x28] sm:$0xff]  ;;  %s2094_s8 = sshll.u32 %s3999_s13, 4 }
  0x15   : > { %188 = vst.msk [vmem:[#allocation2 + $0x70] sm:$0x3] %vm175_vm1, %v2800_v0  ;;  %191 = vst.msk [vmem:[#allocation2 + $0x88] sm:$0x3] %vm175_vm1, %v2800_v0  ;;  %v325_v7 = vld [vmem:[#allocation2 + $0x1] sm:$0xff]  ;;  %v234_v9 = vld [vmem:[%s2908_s18 + $0x30] sm:$0xff]  ;;  %s170_s11 = scalar_lea.vmem %s3948_s3, %s2094_s8 }
  0x16   : > { %189 = vst.msk [vmem:[#allocation2 + $0x78] sm:$0xff] %vm172_vm0, %v2800_v0  ;;  %190 = vst.msk [vmem:[#allocation2 + $0x80] sm:$0xff] %vm172_vm0, %v2800_v0  ;;  %v326_v8 = vld [vmem:[#allocation2 + $0x9] sm:$0xff]  ;;  %v235_v11 = vld [vmem:[%s2908_s18 + $0x38] sm:$0xff] }
  0x17   : > { %192 = vst.msk [vmem:[#allocation2 + $0x90] sm:$0xff] %vm172_vm0, %v2800_v0  ;;  %193 = vst.msk [vmem:[#allocation2 + $0x98] sm:$0xff] %vm172_vm0, %v2800_v0  ;;  %v2139_v10 = vpack.i.bf16 %v326_v8, %v325_v7  ;;  %v236_v12 = vld [vmem:[%s2908_s18 + $0x40] sm:$0xff]  ;;  %v237_v13 = vld [vmem:[%s2908_s18 + $0x48] sm:$0xff] }
  0x18   : > { %194 = vst.msk [vmem:[#allocation2 + $0xa0] sm:$0x3] %vm175_vm1, %v2800_v0  ;;  %197 = vst.msk [vmem:[#allocation2 + $0xb8] sm:$0x3] %vm175_vm1, %v2800_v0  ;;  %v238_v14 = vld [vmem:[%s2908_s18 + $0x50] sm:$0xff]  ;;  %v239_v15 = vld [vmem:[%s2908_s18 + $0x58] sm:$0xff] }
  0x19   : > { %195 = vst.msk [vmem:[#allocation2 + $0xa8] sm:$0xff] %vm172_vm0, %v2800_v0  ;;  %196 = vst.msk [vmem:[#allocation2 + $0xb0] sm:$0xff] %vm172_vm0, %v2800_v0  ;;  %v240_v16 = vld [vmem:[%s2908_s18 + $0x60] sm:$0xff]  ;;  %2140 = vrot.lane.b32.xlu0 %v2139_v10, %s2801_s19  ;;  %v241_v17 = vld [vmem:[%s2908_s18 + $0x68] sm:$0xff] }
  0x1a   : > { %198 = vst.msk [vmem:[#allocation2 + $0xc0] sm:$0xff] %vm172_vm0, %v2800_v0  ;;  %199 = vst.msk [vmem:[#allocation2 + $0xc8] sm:$0xff] %vm172_vm0, %v2800_v0  ;;  %v242_v18 = vld [vmem:[%s2908_s18 + $0x70] sm:$0xff]  ;;  %v243_v19 = vld [vmem:[%s2908_s18 + $0x78] sm:$0xff] }
  0x1b   : > { %200 = vst.msk [vmem:[#allocation2 + $0xd0] sm:$0x3] %vm175_vm1, %v2800_v0  ;;  %203 = vst.msk [vmem:[#allocation2 + $0xe8] sm:$0x3] %vm175_vm1, %v2800_v0  ;;  %v244_v20 = vld [vmem:[%s2908_s18 + $0x80] sm:$0xff]  ;;  %v245_v21 = vld [vmem:[%s2908_s18 + $0x88] sm:$0xff] }
  0x1c   : > { %201 = vst.msk [vmem:[#allocation2 + $0xd8] sm:$0xff] %vm172_vm0, %v2800_v0  ;;  %202 = vst.msk [vmem:[#allocation2 + $0xe0] sm:$0xff] %vm172_vm0, %v2800_v0  ;;  %v246_v22 = vld [vmem:[%s2908_s18 + $0x90] sm:$0xff]  ;;  %v247_v23 = vld [vmem:[%s2908_s18 + $0x98] sm:$0xff] }
  0x1d   : > { %204 = vst.msk [vmem:[#allocation2 + $0xf0] sm:$0xff] %vm172_vm0, %v2800_v0  ;;  %205 = vst.msk [vmem:[#allocation2 + $0xf8] sm:$0xff] %vm172_vm0, %v2800_v0  ;;  %v248_v24 = vld [vmem:[%s2908_s18 + $0xa0] sm:$0xff]  ;;  %v249_v25 = vld [vmem:[%s2908_s18 + $0xa8] sm:$0xff] }
  0x1e   : > { %206 = vst.msk [vmem:[#allocation2 + $0x100] sm:$0x3] %vm175_vm1, %v2800_v0  ;;  %209 = vst.msk [vmem:[#allocation2 + $0x118] sm:$0x3] %vm175_vm1, %v2800_v0  ;;  %v250_v35 = vld [vmem:[%s2908_s18 + $0xb0] sm:$0xff]  ;;  %v251_v36 = vld [vmem:[%s2908_s18 + $0xb8] sm:$0xff] }
  0x1f   : > { %207 = vst.msk [vmem:[#allocation2 + $0x108] sm:$0xff] %vm172_vm0, %v2800_v0  ;;  %208 = vst.msk [vmem:[#allocation2 + $0x110] sm:$0xff] %vm172_vm0, %v2800_v0  ;;  %v252_v50 = vld [vmem:[%s2908_s18 + $0xc0] sm:$0xff]  ;;  %v253_v51 = vld [vmem:[%s2908_s18 + $0xc8] sm:$0xff] }
  0x20   : > { %210 = vst.msk [vmem:[#allocation2 + $0x120] sm:$0xff] %vm172_vm0, %v2800_v0  ;;  %211 = vst.msk [vmem:[#allocation2 + $0x128] sm:$0xff] %vm172_vm0, %v2800_v0  ;;  %v254_v52 = vld [vmem:[%s2908_s18 + $0xd0] sm:$0xff]  ;;  %v255_v53 = vld [vmem:[%s2908_s18 + $0xd8] sm:$0xff] }
  0x21   : > { %212 = vst.msk [vmem:[#allocation2 + $0x130] sm:$0x3] %vm175_vm1, %v2800_v0  ;;  %215 = vst.msk [vmem:[#allocation2 + $0x148] sm:$0x3] %vm175_vm1, %v2800_v0  ;;  %v256_v54 = vld [vmem:[%s2908_s18 + $0xe0] sm:$0xff]  ;;  %v257_v55 = vld [vmem:[%s2908_s18 + $0xe8] sm:$0xff] }
  0x22   : > { %213 = vst.msk [vmem:[#allocation2 + $0x138] sm:$0xff] %vm172_vm0, %v2800_v0  ;;  %214 = vst.msk [vmem:[#allocation2 + $0x140] sm:$0xff] %vm172_vm0, %v2800_v0 }
  0x23   : > { %216 = vst.msk [vmem:[#allocation2 + $0x150] sm:$0xff] %vm172_vm0, %v2800_v0  ;;  %217 = vst.msk [vmem:[#allocation2 + $0x158] sm:$0xff] %vm172_vm0, %v2800_v0 }
  0x24   : > { %218 = vst.msk [vmem:[#allocation2 + $0x160] sm:$0x3] %vm175_vm1, %v2800_v0  ;;  %221 = vst.msk [vmem:[#allocation2 + $0x178] sm:$0x3] %vm175_vm1, %v2800_v0 }
  0x25   : > { %219 = vst.msk [vmem:[#allocation2 + $0x168] sm:$0xff] %vm172_vm0, %v2800_v0  ;;  %220 = vst.msk [vmem:[#allocation2 + $0x170] sm:$0xff] %vm172_vm0, %v2800_v0 }
  0x26   : > { %222 = vst.msk [vmem:[#allocation2 + $0x180] sm:$0xff] %vm172_vm0, %v2800_v0  ;;  %223 = vst.msk [vmem:[#allocation2 + $0x188] sm:$0xff] %vm172_vm0, %v2800_v0 }
  0x27   : > { %224 = vst.msk [vmem:[#allocation2 + $0x190] sm:$0x3] %vm175_vm1, %v2800_v0  ;;  %227 = vst.msk [vmem:[#allocation2 + $0x1a8] sm:$0x3] %vm175_vm1, %v2800_v0 }
  0x28   : > { %225 = vst.msk [vmem:[#allocation2 + $0x198] sm:$0xff] %vm172_vm0, %v2800_v0  ;;  %226 = vst.msk [vmem:[#allocation2 + $0x1a0] sm:$0xff] %vm172_vm0, %v2800_v0 }
  0x29   : > { %263 = vst.msk [vmem:[#allocation2 + $0x31] sm:$0xff] %vm172_vm0, %v230_v1  ;;  %264 = vst.msk [vmem:[#allocation2 + $0x39] sm:$0xff] %vm172_vm0, %v231_v2 }
  0x2a   : > { %261 = vst.msk [vmem:[#allocation2 + $0x19] sm:$0xff] %vm172_vm0, %v228_v3  ;;  %262 = vst.msk [vmem:[#allocation2 + $0x21] sm:$0xff] %vm172_vm0, %v229_v4 }
  0x2b   : > { %265 = vst.msk [vmem:[#allocation2 + $0x49] sm:$0xff] %vm172_vm0, %v232_v5  ;;  %266 = vst.msk [vmem:[#allocation2 + $0x51] sm:$0xff] %vm172_vm0, %v233_v6 }
  0x2c   : > { %267 = vst.msk [vmem:[#allocation2 + $0x61] sm:$0xff] %vm172_vm0, %v234_v9  ;;  %268 = vst.msk [vmem:[#allocation2 + $0x69] sm:$0xff] %vm172_vm0, %v235_v11 }
  0x2d   : > { %269 = vst.msk [vmem:[#allocation2 + $0x79] sm:$0xff] %vm172_vm0, %v236_v12  ;;  %270 = vst.msk [vmem:[#allocation2 + $0x81] sm:$0xff] %vm172_vm0, %v237_v13 }
  0x2e   : > { %271 = vst.msk [vmem:[#allocation2 + $0x91] sm:$0xff] %vm172_vm0, %v238_v14  ;;  %272 = vst.msk [vmem:[#allocation2 + $0x99] sm:$0xff] %vm172_vm0, %v239_v15  ;;  %v357_v14 = vld [vmem:[#allocation2 + $0x2] sm:$0xff]  ;;  %v358_v15 = vld [vmem:[#allocation2 + $0xa] sm:$0xff] }
  0x2f   : > { %273 = vst.msk [vmem:[#allocation2 + $0xa9] sm:$0xff] %vm172_vm0, %v240_v16  ;;  %274 = vst.msk [vmem:[#allocation2 + $0xb1] sm:$0xff] %vm172_vm0, %v241_v17  ;;  %v2219_v17 = vpack.i.bf16 %v358_v15, %v357_v14 }
  0x30   : > { %275 = vst.msk [vmem:[#allocation2 + $0xc1] sm:$0xff] %vm172_vm0, %v242_v18  ;;  %276 = vst.msk [vmem:[#allocation2 + $0xc9] sm:$0xff] %vm172_vm0, %v243_v19  ;;  %v329_v26 = vld [vmem:[#allocation2 + $0x31] sm:$0xff]  ;;  %v330_v27 = vld [vmem:[#allocation2 + $0x39] sm:$0xff] }
  0x31   : > { %277 = vst.msk [vmem:[#allocation2 + $0xd9] sm:$0xff] %vm172_vm0, %v244_v20  ;;  %278 = vst.msk [vmem:[#allocation2 + $0xe1] sm:$0xff] %vm172_vm0, %v245_v21  ;;  %v327_v28 = vld [vmem:[#allocation2 + $0x19] sm:$0xff]  ;;  %v2955_v29 = vpack.i.bf16 %v330_v27, %v329_v26  ;;  %v328_v30 = vld [vmem:[#allocation2 + $0x21] sm:$0xff] }
  0x32   : > { %279 = vst.msk [vmem:[#allocation2 + $0xf1] sm:$0xff] %vm172_vm0, %v246_v22  ;;  %280 = vst.msk [vmem:[#allocation2 + $0xf9] sm:$0xff] %vm172_vm0, %v247_v23  ;;  %v331_v31 = vld [vmem:[#allocation2 + $0x49] sm:$0xff]  ;;  %v332_v32 = vld [vmem:[#allocation2 + $0x51] sm:$0xff]  ;;  %v2957_v33 = vpack.i.bf16 %v328_v30, %v327_v28 }
  0x33   : > { %281 = vst.msk [vmem:[#allocation2 + $0x109] sm:$0xff] %vm172_vm0, %v248_v24  ;;  %282 = vst.msk [vmem:[#allocation2 + $0x111] sm:$0xff] %vm172_vm0, %v249_v25  ;;  %v333_v34 = vld [vmem:[#allocation2 + $0x61] sm:$0xff]  ;;  %2150 = vrot.lane.b32.xlu1 %v2955_v29, %s2801_s19  ;;  %v2963_v37 = vpack.i.bf16 %v332_v32, %v331_v31  ;;  %v334_v38 = vld [vmem:[#allocation2 + $0x69] sm:$0xff] }
  0x34   : > { %283 = vst.msk [vmem:[#allocation2 + $0x121] sm:$0xff] %vm172_vm0, %v250_v35  ;;  %284 = vst.msk [vmem:[#allocation2 + $0x129] sm:$0xff] %vm172_vm0, %v251_v36  ;;  %2145 = vrot.lane.b32.xlu0 %v2957_v33, %s2801_s19  ;;  %v2969_v39 = vpack.i.bf16 %v334_v38, %v333_v34  ;;  %v335_v40 = vld [vmem:[#allocation2 + $0x79] sm:$0xff]  ;;  %v336_v41 = vld [vmem:[#allocation2 + $0x81] sm:$0xff] }
  0x35   : > { %v337_v42 = vld [vmem:[#allocation2 + $0x91] sm:$0xff]  ;;  %v338_v43 = vld [vmem:[#allocation2 + $0x99] sm:$0xff]  ;;  %v2164_v45 = vpack.i.bf16 %v336_v41, %v335_v40  ;;  %285 = vst.msk [vmem:[#allocation2 + $0x139] sm:$0xff] %vm172_vm0, %v252_v50  ;;  %286 = vst.msk [vmem:[#allocation2 + $0x141] sm:$0xff] %vm172_vm0, %v253_v51 }
  0x36   : > { %v339_v44 = vld [vmem:[#allocation2 + $0xa9] sm:$0xff]  ;;  %v340_v46 = vld [vmem:[#allocation2 + $0xb1] sm:$0xff]  ;;  %v2169_v49 = vpack.i.bf16 %v338_v43, %v337_v42  ;;  %287 = vst.msk [vmem:[#allocation2 + $0x151] sm:$0xff] %vm172_vm0, %v254_v52  ;;  %288 = vst.msk [vmem:[#allocation2 + $0x159] sm:$0xff] %vm172_vm0, %v255_v53 }
  0x37   : > { %2155 = vrot.lane.b32.xlu1 %v2963_v37, %s2801_s19  ;;  %v341_v47 = vld [vmem:[#allocation2 + $0xc1] sm:$0xff]  ;;  %v342_v48 = vld [vmem:[#allocation2 + $0xc9] sm:$0xff]  ;;  %289 = vst.msk [vmem:[#allocation2 + $0x169] sm:$0xff] %vm172_vm0, %v256_v54  ;;  %290 = vst.msk [vmem:[#allocation2 + $0x171] sm:$0xff] %vm172_vm0, %v257_v55  ;;  %v2174_v56 = vpack.i.bf16 %v340_v46, %v339_v44 }
  0x38   : > { %2160 = vrot.lane.b32.xlu0 %v2969_v39, %s2801_s19  ;;  %v2179_v57 = vpack.i.bf16 %v342_v48, %v341_v47  ;;  %v343_v58 = vld [vmem:[#allocation2 + $0xd9] sm:$0xff]  ;;  %v344_v59 = vld [vmem:[#allocation2 + $0xe1] sm:$0xff]  ;;  %v363_v24 = vld [vmem:[#allocation2 + $0x4a] sm:$0xff] }
  0x39   : > { %v345_v60 = vld [vmem:[#allocation2 + $0xf1] sm:$0xff]  ;;  %v346_v61 = vld [vmem:[#allocation2 + $0xf9] sm:$0xff]  ;;  %v2990_v62 = vpack.i.bf16 %v344_v59, %v343_v58  ;;  %v360_v19 = vld [vmem:[#allocation2 + $0x22] sm:$0xff] }
  0x3a   : > { %v2993_v63 = vpack.i.bf16 %v346_v61, %v345_v60  ;;  %v347_v0 = vld [vmem:[#allocation2 + $0x109] sm:$0xff]  ;;  %v348_v1 = vld [vmem:[#allocation2 + $0x111] sm:$0xff]  ;;  %v359_v18 = vld [vmem:[#allocation2 + $0x1a] sm:$0xff] }
  0x3b   : > { %2165 = vrot.lane.b32.xlu1 %v2164_v45, %s2801_s19  ;;  %v349_v2 = vld [vmem:[#allocation2 + $0x121] sm:$0xff]  ;;  %v350_v3 = vld [vmem:[#allocation2 + $0x129] sm:$0xff]  ;;  %v2997_v4 = vpack.i.bf16 %v348_v1, %v347_v0  ;;  %v361_v20 = vld [vmem:[#allocation2 + $0x32] sm:$0xff]  ;;  %v3013_v22 = vpack.i.bf16 %v360_v19, %v359_v18 }
  0x3c   : > { %2170 = vrot.lane.b32.xlu0 %v2169_v49, %s2801_s19  ;;  %v3001_v5 = vpack.i.bf16 %v350_v3, %v349_v2  ;;  %v351_v6 = vld [vmem:[#allocation2 + $0x139] sm:$0xff]  ;;  %v352_v7 = vld [vmem:[#allocation2 + $0x141] sm:$0xff]  ;;  %v366_v27 = vld [vmem:[#allocation2 + $0x6a] sm:$0xff] }
  0x3d   : > { %v353_v8 = vld [vmem:[#allocation2 + $0x151] sm:$0xff]  ;;  %v354_v9 = vld [vmem:[#allocation2 + $0x159] sm:$0xff]  ;;  %v3005_v10 = vpack.i.bf16 %v352_v7, %v351_v6  ;;  %v365_v26 = vld [vmem:[#allocation2 + $0x62] sm:$0xff] }
  0x3e   : > { %v2209_v11 = vpack.i.bf16 %v354_v9, %v353_v8  ;;  %v355_v12 = vld [vmem:[#allocation2 + $0x169] sm:$0xff]  ;;  %v356_v13 = vld [vmem:[#allocation2 + $0x171] sm:$0xff]  ;;  %v362_v21 = vld [vmem:[#allocation2 + $0x3a] sm:$0xff]  ;;  %v3028_v32 = vpack.i.bf16 %v366_v27, %v365_v26 }
  0x3f   : > { %2175 = vrot.lane.b32.xlu1 %v2174_v56, %s2801_s19  ;;  %v2214_v16 = vpack.i.bf16 %v356_v13, %v355_v12  ;;  %v3016_v23 = vpack.i.bf16 %v362_v21, %v361_v20  ;;  %v364_v25 = vld [vmem:[#allocation2 + $0x52] sm:$0xff]  ;;  %v367_v34 = vld [vmem:[#allocation2 + $0x7a] sm:$0xff]  ;;  %v368_v35 = vld [vmem:[#allocation2 + $0x82] sm:$0xff] }
  0x40   : > { %2180 = vrot.lane.b32.xlu0 %v2179_v57, %s2801_s19  ;;  %v258_v28 = vld [vmem:[%s2908_s18 + $0xf0] sm:$0xff]  ;;  %v259_v30 = vld [vmem:[%s2908_s18 + $0xf8] sm:$0xff]  ;;  %v3024_v31 = vpack.i.bf16 %v364_v25, %v363_v24  ;;  %v3032_v40 = vpack.i.bf16 %v368_v35, %v367_v34  ;;  %v373_v44 = vld [vmem:[#allocation2 + $0xc2] sm:$0xff] }
  0x41   : > { %291 = vst.msk [vmem:[#allocation2 + $0x181] sm:$0xff] %vm172_vm0, %v258_v28  ;;  %292 = vst.msk [vmem:[#allocation2 + $0x189] sm:$0xff] %vm172_vm0, %v259_v30  ;;  %v369_v36 = vld [vmem:[#allocation2 + $0x92] sm:$0xff]  ;;  %v370_v38 = vld [vmem:[#allocation2 + $0x9a] sm:$0xff] }
  0x42   : > { %v2249_v41 = vpack.i.bf16 %v370_v38, %v369_v36  ;;  %v371_v42 = vld [vmem:[#allocation2 + $0xaa] sm:$0xff]  ;;  %v372_v43 = vld [vmem:[#allocation2 + $0xb2] sm:$0xff]  ;;  %v375_v48 = vld [vmem:[#allocation2 + $0xda] sm:$0xff] }
  0x43   : > { %2185 = vrot.lane.b32.xlu1 %v2990_v62, %s2801_s19  ;;  %v374_v45 = vld [vmem:[#allocation2 + $0xca] sm:$0xff]  ;;  %v2254_v46 = vpack.i.bf16 %v372_v43, %v371_v42  ;;  %v376_v49 = vld [vmem:[#allocation2 + $0xe2] sm:$0xff]  ;;  %v377_v50 = vld [vmem:[#allocation2 + $0xf2] sm:$0xff] }
  0x44   : > { %2190 = vrot.lane.b32.xlu0 %v2993_v63, %s2801_s19  ;;  %v2259_v47 = vpack.i.bf16 %v374_v45, %v373_v44  ;;  %v378_v51 = vld [vmem:[#allocation2 + $0xfa] sm:$0xff]  ;;  %v3040_v52 = vpack.i.bf16 %v376_v49, %v375_v48  ;;  %v379_v54 = vld [vmem:[#allocation2 + $0x10a] sm:$0xff]  ;;  %v380_v55 = vld [vmem:[#allocation2 + $0x112] sm:$0xff] }
  0x45   : > { %v3043_v53 = vpack.i.bf16 %v378_v51, %v377_v50  ;;  %v381_v56 = vld [vmem:[#allocation2 + $0x122] sm:$0xff]  ;;  %v382_v57 = vld [vmem:[#allocation2 + $0x12a] sm:$0xff]  ;;  %v3047_v58 = vpack.i.bf16 %v380_v55, %v379_v54  ;;  %v383_v60 = vld [vmem:[#allocation2 + $0x13a] sm:$0xff] }
  0x46   : > { %v3051_v59 = vpack.i.bf16 %v382_v57, %v381_v56  ;;  %v384_v61 = vld [vmem:[#allocation2 + $0x142] sm:$0xff]  ;;  %v385_v0 = vld [vmem:[#allocation2 + $0x152] sm:$0xff]  ;;  %v386_v1 = vld [vmem:[#allocation2 + $0x15a] sm:$0xff] }
  0x47   : > { %2195 = vrot.lane.b32.xlu1 %v2997_v4, %s2801_s19  ;;  %v3055_v2 = vpack.i.bf16 %v384_v61, %v383_v60  ;;  %v2289_v3 = vpack.i.bf16 %v386_v1, %v385_v0  ;;  %v387_v6 = vld [vmem:[#allocation2 + $0x16a] sm:$0xff]  ;;  %v388_v7 = vld [vmem:[#allocation2 + $0x172] sm:$0xff]  ;;  %v3061_v9 = vld [vmem:[#allocation2 + $0x20] sm:$0xff] }
  0x48   : > { %2200 = vrot.lane.b32.xlu0 %v3001_v5, %s2801_s19  ;;  %v3059_v8 = vld [vmem:[#allocation2 + $0x18] sm:$0xff]  ;;  %3967 = vst [vmem:[#allocation4_spill] sm:$0xff] %v3061_v9  ;;  %v391_v13 = vld [vmem:[#allocation2 + $0x30] sm:$0xff]  ;;  %v393_v15 = vld [vmem:[#allocation2 + $0x48] sm:$0xff] }
  0x49   : > { %3966 = vst [vmem:[#allocation3_spill] sm:$0xff] %v3059_v8  ;;  %v2299_v12 = vpack.i.bf16 %v3061_v9, %v3059_v8  ;;  %v392_v14 = vld [vmem:[#allocation2 + $0x38] sm:$0xff]  ;;  %v3074_v19 = vld [vmem:[#allocation2 + $0x60] sm:$0xff]  ;;  %v3076_v20 = vld [vmem:[#allocation2 + $0x68] sm:$0xff] }
  0x4a   : > { %v3078_v21 = vld [vmem:[#allocation2 + $0x78] sm:$0xff]  ;;  %v3080_v24 = vld [vmem:[#allocation2 + $0x80] sm:$0xff]  ;;  %v3086_v25 = vpack.i.bf16 %v3076_v20, %v3074_v19  ;;  %v3094_v27 = vld [vmem:[#allocation2 + $0x90] sm:$0xff] }
  0x4b   : > { %2205 = vrot.lane.b32.xlu1 %v3005_v10, %s2801_s19  ;;  %v3092_v26 = vpack.i.bf16 %v3080_v24, %v3078_v21  ;;  %v3096_v28 = vld [vmem:[#allocation2 + $0x98] sm:$0xff]  ;;  %v3098_v30 = vld [vmem:[#allocation2 + $0xa8] sm:$0xff]  ;;  %v3100_v34 = vld [vmem:[#allocation2 + $0xb0] sm:$0xff] }
  0x4c   : > { %2210 = vrot.lane.b32.xlu0 %v2209_v11, %s2801_s19  ;;  %v2294_v11 = vpack.i.bf16 %v388_v7, %v387_v6  ;;  %v3106_v35 = vpack.i.bf16 %v3096_v28, %v3094_v27  ;;  %v2329_v36 = vpack.i.bf16 %v3100_v34, %v3098_v30  ;;  %v3112_v38 = vld [vmem:[#allocation2 + $0xc0] sm:$0xff]  ;;  %v3116_v42 = vld [vmem:[#allocation2 + $0xd8] sm:$0xff]  ;;  %v409_v48 = vld [vmem:[#allocation2 + $0x108] sm:$0xff] }
  0x4d   : > { %3968 = vst [vmem:[#allocation5_spill] sm:$0xff] %v3116_v42  ;;  %v3118_v43 = vld [vmem:[#allocation2 + $0xe0] sm:$0xff]  ;;  %v410_v49 = vld [vmem:[#allocation2 + $0x110] sm:$0xff]  ;;  %v3131_v55 = vld [vmem:[#allocation2 + $0x128] sm:$0xff] }
  0x4e   : > { %3969 = vst [vmem:[#allocation6_spill] sm:$0xff] %v3118_v43  ;;  %v2339_v45 = vpack.i.bf16 %v3118_v43, %v3116_v42  ;;  %v2349_v51 = vpack.i.bf16 %v410_v49, %v409_v48  ;;  %v3129_v54 = vld [vmem:[#allocation2 + $0x120] sm:$0xff]  ;;  %v3133_v56 = vld [vmem:[#allocation2 + $0x138] sm:$0xff]  ;;  %v3147_v0 = vld [vmem:[#allocation2 + $0x150] sm:$0xff] }
  0x4f   : > { %2215 = vrot.lane.b32.xlu1 %v2214_v16, %s2801_s19  ;;  %v394_v16 = vld [vmem:[#allocation2 + $0x50] sm:$0xff]  ;;  %v3135_v57 = vld [vmem:[#allocation2 + $0x140] sm:$0xff]  ;;  %v3140_v60 = vpack.i.bf16 %v3131_v55, %v3129_v54  ;;  %v3149_v1 = vld [vmem:[#allocation2 + $0x158] sm:$0xff] }
  0x50   : > { %2220 = vrot.lane.b32.xlu0 %v2219_v17, %s2802_s20  ;;  %v3069_v17 = vpack.i.bf16 %v392_v14, %v391_v13  ;;  %v3072_v18 = vpack.i.bf16 %v394_v16, %v393_v15  ;;  %v3145_v61 = vpack.i.bf16 %v3135_v57, %v3133_v56  ;;  %v3153_v6 = vld [vmem:[#allocation2 + $0x170] sm:$0xff]  ;;  %v3159_v7 = vpack.i.bf16 %v3149_v1, %v3147_v0  ;;  %v420_v13 = vld [vmem:[#allocation2 + $0x188] sm:$0xff] }
  0x51   : > { %v574_v42 = vld [vmem:[#allocation2 + $0x152] sm:$0xff] }
  0x53   : > { %2225 = vrot.lane.b32.xlu1 %v3013_v22, %s2802_s20 }
  0x54   : > { %2230 = vrot.lane.b32.xlu0 %v3016_v23, %s2802_s20 }
  0x57   : > { %2235 = vrot.lane.b32.xlu1 %v3024_v31, %s2802_s20 }
  0x58   : > { %2240 = vrot.lane.b32.xlu0 %v3028_v32, %s2802_s20 }
  0x5b   : > { %2245 = vrot.lane.b32.xlu1 %v3032_v40, %s2802_s20 }
  0x5c   : > { %2250 = vrot.lane.b32.xlu0 %v2249_v41, %s2802_s20  ;;  %v3114_v41 = vld [vmem:[#allocation2 + $0xc8] sm:$0xff] }
  0x5d   : > { %v2334_v44 = vpack.i.bf16 %v3114_v41, %v3112_v38 }
  0x5f   : > { %2255 = vrot.lane.b32.xlu1 %v2254_v46, %s2802_s20  ;;  %v407_v46 = vld [vmem:[#allocation2 + $0xf0] sm:$0xff] }
  0x60   : > { %2260 = vrot.lane.b32.xlu0 %v2259_v47, %s2802_s20  ;;  %v408_v47 = vld [vmem:[#allocation2 + $0xf8] sm:$0xff] }
  0x61   : > { %v2344_v50 = vpack.i.bf16 %v408_v47, %v407_v46 }
  0x63   : > { %2265 = vrot.lane.b32.xlu1 %v3040_v52, %s2802_s20 }
  0x64   : > { %2270 = vrot.lane.b32.xlu0 %v3043_v53, %s2802_s20 }
  0x67   : > { %2275 = vrot.lane.b32.xlu1 %v3047_v58, %s2802_s20 }
  0x68   : > { %2280 = vrot.lane.b32.xlu0 %v3051_v59, %s2802_s20 }
  0x6b   : > { %2285 = vrot.lane.b32.xlu1 %v3055_v2, %s2802_s20 }
  0x6c   : > { %2290 = vrot.lane.b32.xlu0 %v2289_v3, %s2802_s20  ;;  %v3151_v3 = vld [vmem:[#allocation2 + $0x168] sm:$0xff] }
  0x6f   : > { %2295 = vrot.lane.b32.xlu1 %v2294_v11, %s2802_s20  ;;  %v3165_v11 = vpack.i.bf16 %v3153_v6, %v3151_v3 }
  0x70   : > { %2300 = vrot.lane.b32.xlu0 %v2299_v12, %s2803_s21  ;;  %v419_v12 = vld [vmem:[#allocation2 + $0x180] sm:$0xff] }
  0x71   : > { %v2374_v14 = vpack.i.bf16 %v420_v13, %v419_v12 }
  0x73   : > { %2305 = vrot.lane.b32.xlu1 %v3069_v17, %s2803_s21 }
  0x74   : > { %2310 = vrot.lane.b32.xlu0 %v3072_v18, %s2803_s21 }
  0x77   : > { %2315 = vrot.lane.b32.xlu1 %v3086_v25, %s2803_s21 }
  0x78   : > { %2320 = vrot.lane.b32.xlu0 %v3092_v26, %s2803_s21 }
  0x7b   : > { %2325 = vrot.lane.b32.xlu1 %v3106_v35, %s2803_s21 }
  0x7c   : > { %2330 = vrot.lane.b32.xlu0 %v2329_v36, %s2803_s21 }
  0x7f   : > { %2335 = vrot.lane.b32.xlu1 %v2334_v44, %s2803_s21 }
  0x80   : > { %2340 = vrot.lane.b32.xlu0 %v2339_v45, %s2803_s21 }
  0x83   : > { %2345 = vrot.lane.b32.xlu1 %v2344_v50, %s2803_s21 }
  0x84   : > { %2350 = vrot.lane.b32.xlu0 %v2349_v51, %s2803_s21 }
  0x87   : > { %2355 = vrot.lane.b32.xlu1 %v3140_v60, %s2803_s21 }
  0x88   : > { %2360 = vrot.lane.b32.xlu0 %v3145_v61, %s2803_s21 }
  0x8b   : > { %2365 = vrot.lane.b32.xlu1 %v3159_v7, %s2803_s21 }
  0x8c   : > { %2370 = vrot.lane.b32.xlu0 %v3165_v11, %s2803_s21 }
  0x8f   : > { %2375 = vrot.lane.b32.xlu1 %v2374_v14, %s2803_s21 }
  0x90   : > { %2380 = vrot.lane.b32.xlu0 %v2957_v33, %s2804_s22  ;;  %v3189_v33 = vpop.permute.xlu0 %2140 }
  0x93   : > { %2385 = vrot.lane.b32.xlu1 %v2990_v62, %s2804_s22 }
  0x94   : > { %2390 = vrot.lane.b32.xlu0 %v3013_v22, %s2805_s23 }
  0x97   : > { %2395 = vrot.lane.b32.xlu1 %v3040_v52, %s2805_s23 }
  0x98   : > { %2400 = vrot.lane.b32.xlu0 %v3069_v17, %s2806_s24 }
  0x9b   : > { %2405 = vrot.lane.b32.xlu1 %v2344_v50, %s2806_s24  ;;  %v524_v50 = vld [vmem:[#allocation2 + $0x79] sm:$0xff] }
  0x9c   : > { %2410 = vrot.lane.b32.xlu0 %v2955_v29, %s2807_s25 }
  0x9f   : > { %2415 = vrot.lane.b32.xlu1 %v2993_v63, %s2807_s25 }
  0xa0   : > { %2420 = vrot.lane.b32.xlu0 %v3016_v23, %s2808_s26 }
  0xa3   : > { %2425 = vrot.lane.b32.xlu1 %v3043_v53, %s2808_s26 }
  0xa4   : > { %2430 = vrot.lane.b32.xlu0 %v2955_v29, %s2804_s22 }
  0xa5   : > { %v3195_v62 = vpop.permute.xlu1 %2150 }
  0xa6   : > { %3970 = vst [vmem:[#allocation7_spill] sm:$0xff] %v3195_v62  ;;  %v3197_v22 = vpop.permute.xlu0 %2145 }
  0xa7   : > { %2435 = vrot.lane.b32.xlu1 %v2993_v63, %s2804_s22 }
  0xa8   : > { %2440 = vrot.lane.b32.xlu0 %v3016_v23, %s2805_s23 }
  0xa9   : > { %v3203_v52 = vpop.permute.xlu1 %2155 }
  0xaa   : > { %3971 = vst [vmem:[#allocation8_spill] sm:$0xff] %v3203_v52  ;;  %v3205_v15 = vpop.permute.xlu0 %2160 }
  0xab   : > { %2445 = vrot.lane.b32.xlu1 %v3043_v53, %s2805_s23  ;;  %v2162_v52 = vunpack.i.l.bf16 %v3205_v15 }
  0xac   : > { %2450 = vrot.lane.b32.xlu0 %v3072_v18, %s2806_s24 }
  0xad   : > { %v3211_v29 = vpop.permute.xlu1 %2165 }
  0xae   : > { %v3213_v16 = vpop.permute.xlu0 %2170 }
  0xaf   : > { %2455 = vrot.lane.b32.xlu1 %v2349_v51, %s2806_s24  ;;  %v525_v51 = vld [vmem:[#allocation2 + $0x81] sm:$0xff]  ;;  %v2173_v43 = vunpack.i.h.bf16 %v3213_v16 }
  0xb0   : > { %2460 = vrot.lane.b32.xlu0 %v2963_v37, %s2807_s25 }
  0xb1   : > { %v3218_v63 = vpop.permute.xlu1 %2175 }
  0xb2   : > { %v3220_v23 = vpop.permute.xlu0 %2180 }
  0xb3   : > { %2465 = vrot.lane.b32.xlu1 %v2997_v4, %s2807_s25 }
  0xb4   : > { %2470 = vrot.lane.b32.xlu0 %v3024_v31, %s2808_s26 }
  0xb5   : > { %v3226_v53 = vpop.permute.xlu1 %2185 }
  0xb6   : > { %v3228_v17 = vpop.permute.xlu0 %2190 }
  0xb7   : > { %3972 = vst [vmem:[#allocation9_spill] sm:$0xff] %v3228_v17  ;;  %2475 = vrot.lane.b32.xlu1 %v3047_v58, %s2808_s26  ;;  %v2167_v17 = vunpack.i.l.bf16 %v3211_v29 }
  0xb8   : > { %2480 = vrot.lane.b32.xlu0 %v2963_v37, %s2804_s22 }
  0xb9   : > { %v3234_v18 = vpop.permute.xlu1 %2195 }
  0xba   : > { %3973 = vst [vmem:[#allocation10_spill] sm:$0xff] %v3234_v18  ;;  %v3236_v36 = vpop.permute.xlu0 %2200  ;;  %v2163_v18 = vunpack.i.h.bf16 %v3205_v15 }
  0xbb   : > { %2485 = vrot.lane.b32.xlu1 %v2997_v4, %s2804_s22 }
  0xbc   : > { %2490 = vrot.lane.b32.xlu0 %v3024_v31, %s2805_s23  ;;  %v1615_v9 = vsel %vm172_vm0, %v3076_v20, %v2163_v18 }
  0xbd   : > { %v3242_v44 = vpop.permute.xlu1 %2205 }
  0xbe   : > { %v3244_v45 = vpop.permute.xlu0 %2210 }
  0xbf   : > { %2495 = vrot.lane.b32.xlu1 %v3047_v58, %s2805_s23 }
  0xc0   : > { %2500 = vrot.lane.b32.xlu0 %v3086_v25, %s2806_s24 }
  0xc1   : > { %v3250_v37 = vpop.permute.xlu1 %2215 }
  0xc2   : > { %v3252_v46 = vpop.permute.xlu0 %2220 }
  0xc3   : > { %2505 = vrot.lane.b32.xlu1 %v3140_v60, %s2806_s24 }
  0xc4   : > { %2510 = vrot.lane.b32.xlu0 %v2969_v39, %s2807_s25 }
  0xc5   : > { %v3258_v4 = vpop.permute.xlu1 %2225 }
  0xc6   : > { %3974 = vst [vmem:[#allocation11_spill] sm:$0xff] %v3258_v4  ;;  %v3260_v31 = vpop.permute.xlu0 %2230 }
  0xc7   : > { %3975 = vst [vmem:[#allocation12_spill] sm:$0xff] %v3260_v31  ;;  %2515 = vrot.lane.b32.xlu1 %v3001_v5, %s2807_s25  ;;  %v2168_v31 = vunpack.i.h.bf16 %v3211_v29 }
  0xc8   : > { %2520 = vrot.lane.b32.xlu0 %v3028_v32, %s2808_s26 }
  0xc9   : > { %v3266_v58 = vpop.permute.xlu1 %2235 }
  0xca   : > { %3976 = vst [vmem:[#allocation13_spill] sm:$0xff] %v3266_v58  ;;  %v3268_v25 = vpop.permute.xlu0 %2240  ;;  %v527_v58 = vld [vmem:[#allocation2 + $0x99] sm:$0xff] }
  0xcb   : > { %2525 = vrot.lane.b32.xlu1 %v3051_v59, %s2808_s26  ;;  %v2243_v15 = vunpack.i.h.bf16 %v3268_v25 }
  0xcc   : > { %2530 = vrot.lane.b32.xlu0 %v2969_v39, %s2804_s22  ;;  %v2559_v39 = vpack.i.bf16 %v525_v51, %v524_v50 }
  0xcd   : > { %v3274_v47 = vpop.permute.xlu1 %2245 }
  0xce   : > { %v3276_v48 = vpop.permute.xlu0 %2250 }
  0xcf   : > { %2535 = vrot.lane.b32.xlu1 %v3001_v5, %s2804_s22 }
  0xd0   : > { %2540 = vrot.lane.b32.xlu0 %v3028_v32, %s2805_s23 }
  0xd1   : > { %v3282_v49 = vpop.permute.xlu1 %2255 }
  0xd2   : > { %v3284_v60 = vpop.permute.xlu0 %2260 }
  0xd3   : > { %2545 = vrot.lane.b32.xlu1 %v3051_v59, %s2805_s23  ;;  %v445_v59 = vld [vmem:[#allocation2 + $0x139] sm:$0xff] }
  0xd4   : > { %2550 = vrot.lane.b32.xlu0 %v3092_v26, %s2806_s24  ;;  %v446_v26 = vld [vmem:[#allocation2 + $0x141] sm:$0xff] }
  0xd5   : > { %v3290_v12 = vpop.permute.xlu1 %2265 }
  0xd6   : > { %3977 = vst [vmem:[#allocation14_spill] sm:$0xff] %v3290_v12  ;;  %v3292_v13 = vpop.permute.xlu0 %2270  ;;  %v2172_v12 = vunpack.i.l.bf16 %v3213_v16  ;;  %v1614_v16 = vsel %vm172_vm0, %v3074_v19, %v2162_v52  ;;  %v1619_v19 = vsel %vm172_vm0, %v3096_v28, %v2173_v43  ;;  %v2178_v28 = vunpack.i.h.bf16 %v3218_v63 }
  0xd7   : > { %3978 = vst [vmem:[#allocation15_spill] sm:$0xff] %v3292_v13  ;;  %2555 = vrot.lane.b32.xlu1 %v3145_v61, %s2806_s24  ;;  %v2584_v61 = vpack.i.bf16 %v446_v26, %v445_v59  ;;  %v542_v59 = vld [vmem:[#allocation2 + $0x151] sm:$0xff]  ;;  %v543_v26 = vld [vmem:[#allocation2 + $0x159] sm:$0xff]  ;;  %v2177_v43 = vunpack.i.l.bf16 %v3218_v63 }
  0xd8   : > { %2560 = vrot.lane.b32.xlu0 %v2559_v39, %s2807_s25  ;;  %v1618_v52 = vsel %vm172_vm0, %v3094_v27, %v2172_v12 }
  0xd9   : > { %v3297_v5 = vpop.permute.xlu1 %2275 }
  0xda   : > { %3979 = vst [vmem:[#allocation16_spill] sm:$0xff] %v3297_v5  ;;  %v3299_v32 = vpop.permute.xlu0 %2280 }
  0xdb   : > { %2565 = vrot.lane.b32.xlu1 %v3005_v10, %s2807_s25  ;;  %v526_v10 = vld [vmem:[#allocation2 + $0x91] sm:$0xff] }
  0xdc   : > { %2570 = vrot.lane.b32.xlu0 %v3032_v40, %s2808_s26  ;;  %v2609_v29 = vpack.i.bf16 %v527_v58, %v526_v10  ;;  %v2248_v58 = vunpack.i.h.bf16 %v3274_v47  ;;  %v2247_v10 = vunpack.i.l.bf16 %v3274_v47 }
  0xdd   : > { %v3305_v14 = vpop.permute.xlu1 %2285 }
  0xde   : > { %v3307_v50 = vpop.permute.xlu0 %2290 }
  0xdf   : > { %2575 = vrot.lane.b32.xlu1 %v3055_v2, %s2808_s26 }
  0xe0   : > { %2580 = vrot.lane.b32.xlu0 %v2559_v39, %s2804_s22  ;;  %v558_v39 = vld [vmem:[#allocation2 + $0x92] sm:$0xff] }
  0xe1   : > { %v3312_v51 = vpop.permute.xlu1 %2295 }
  0xe2   : > { %v3314_v5 = vpop.permute.xlu0 %2300 }
  0xe3   : > { %2585 = vrot.lane.b32.xlu1 %v2584_v61, %s2804_s22  ;;  %v559_v61 = vld [vmem:[#allocation2 + $0x9a] sm:$0xff] }
  0xe4   : > { %2590 = vrot.lane.b32.xlu0 %v3032_v40, %s2805_s23  ;;  %v575_v40 = vld [vmem:[#allocation2 + $0x15a] sm:$0xff]  ;;  %v3343_v4 = vpack.i.bf16 %v559_v61, %v558_v39  ;;  %v2257_v39 = vunpack.i.l.bf16 %v3282_v49 }
  0xe5   : > { %v3321_v13 = vpop.permute.xlu1 %2305 }
  0xe6   : > { %3980 = vst [vmem:[#allocation17_spill] sm:$0xff] %v3321_v13  ;;  %v3325_v62 = vpop.permute.xlu0 %2310  ;;  %v2242_v13 = vunpack.i.l.bf16 %v3268_v25  ;;  %v1617_v25 = vsel %vm172_vm0, %v3080_v24, %v2168_v31  ;;  %v2252_v31 = vunpack.i.l.bf16 %v3276_v48 }
  0xe7   : > { %3981 = vst [vmem:[#allocation18_spill] sm:$0xff] %v3325_v62  ;;  %2595 = vrot.lane.b32.xlu1 %v3055_v2, %s2805_s23  ;;  %v3335_v62 = vpack.i.bf16 %v543_v26, %v542_v59  ;;  %v3345_v2 = vpack.i.bf16 %v575_v40, %v574_v42  ;;  %v1650_v12 = vsel %vm1638_vm2, %v1617_v25, %v2248_v58  ;;  %v2258_v26 = vunpack.i.h.bf16 %v3282_v49 }
  0xe8   : > { %2600 = vrot.lane.b32.xlu0 %v3106_v35, %s2806_s24  ;;  %v1616_v35 = vsel %vm172_vm0, %v3078_v21, %v2167_v17  ;;  %v1647_v24 = vsel %vm1638_vm2, %v1614_v16, %v2242_v13  ;;  %v1648_v21 = vsel %vm1638_vm2, %v1615_v9, %v2243_v15  ;;  %v2253_v17 = vunpack.i.h.bf16 %v3276_v48 }
  0xe9   : > { %v3341_v8 = vpop.permute.xlu1 %2315  ;;  %v1649_v9 = vsel %vm1638_vm2, %v1616_v35, %v2247_v10  ;;  %v1651_v40 = vsel %vm1638_vm2, %v1618_v52, %v2252_v31  ;;  %v1621_v10 = vsel %vm172_vm0, %v3100_v34, %v2178_v28  ;;  %v497_v34 = vld [vmem:[#allocation2 + $0xb0] sm:$0xff]  ;;  %v2203_v31 = vunpack.i.h.bf16 %v3236_v36 }
  0xea   : > { %v2321_v20 = vpop.permute.xlu0 %2320  ;;  %v1652_v15 = vsel %vm1638_vm2, %v1619_v19, %v2253_v17  ;;  %v2202_v28 = vunpack.i.l.bf16 %v3236_v36  ;;  %v2283_v36 = vunpack.i.h.bf16 %v3299_v32 }
  0xeb   : > { %v2323_v18 = vunpack.i.h.bf16 %v2321_v20  ;;  %v2322_v42 = vunpack.i.l.bf16 %v2321_v20  ;;  %2605 = vrot.lane.b32.xlu1 %v3159_v7, %s2806_s24  ;;  %v1620_v20 = vsel %vm172_vm0, %v3098_v30, %v2177_v43  ;;  %v496_v30 = vld [vmem:[#allocation2 + $0xa8] sm:$0xff] }
  0xec   : > { %2610 = vrot.lane.b32.xlu0 %v2609_v29, %s2807_s25 }
  0xed   : > { %v3367_v27 = vsel %vm1671_vm3, %v1647_v24, %v2322_v42  ;;  %v3370_v47 = vsel %vm1671_vm3, %v1648_v21, %v2323_v18  ;;  %v2326_v7 = vpop.permute.xlu1 %2325  ;;  %v1654_v42 = vsel %vm1638_vm2, %v1621_v10, %v2258_v26  ;;  %v1653_v24 = vsel %vm1638_vm2, %v1620_v20, %v2257_v39  ;;  %v545_v26 = vld [vmem:[#allocation2 + $0x171] sm:$0xff] }
  0xee   : > { %v2328_v13 = vunpack.i.h.bf16 %v2326_v7  ;;  %v2327_v59 = vunpack.i.l.bf16 %v2326_v7  ;;  %v2331_v48 = vpop.permute.xlu0 %2330  ;;  %v528_v7 = vld [vmem:[#allocation2 + $0xa9] sm:$0xff]  ;;  %v1630_v10 = vsel %vm172_vm0, %v3129_v54, %v2202_v28 }
  0xef   : > { %v2333_v61 = vunpack.i.h.bf16 %v2331_v48  ;;  %v2332_v63 = vunpack.i.l.bf16 %v2331_v48  ;;  %2615 = vrot.lane.b32.xlu1 %v3335_v62, %s2807_s25  ;;  %v560_v39 = vld [vmem:[#allocation2 + $0xaa] sm:$0xff] }
  0xf0   : > { %v3381_v16 = vsel %vm1671_vm3, %v1649_v9, %v2327_v59  ;;  %v3384_v25 = vsel %vm1671_vm3, %v1650_v12, %v2328_v13  ;;  %2620 = vrot.lane.b32.xlu0 %v3343_v4, %s2808_s26  ;;  %v529_v12 = vld [vmem:[#allocation2 + $0xb1] sm:$0xff]  ;;  %v544_v9 = vld [vmem:[#allocation2 + $0x169] sm:$0xff]  ;;  %v2208_v13 = vunpack.i.h.bf16 %v3242_v44  ;;  %v2207_v59 = vunpack.i.l.bf16 %v3242_v44 }
  0xf1   : > { %v3389_v49 = vsel %vm1671_vm3, %v1651_v40, %v2332_v63  ;;  %v3392_v35 = vsel %vm1671_vm3, %v1652_v15, %v2333_v61  ;;  %v2336_v58 = vpop.permute.xlu1 %2335  ;;  %v2213_v61 = vunpack.i.h.bf16 %v3244_v45  ;;  %v2212_v63 = vunpack.i.l.bf16 %v3244_v45 }
  0xf2   : > { %v2338_v19 = vunpack.i.h.bf16 %v2336_v58  ;;  %v2337_v52 = vunpack.i.l.bf16 %v2336_v58  ;;  %v3398_v18 = vpop.permute.xlu0 %2340  ;;  %v2282_v40 = vunpack.i.l.bf16 %v3299_v32  ;;  %v2649_v44 = vpack.i.bf16 %v497_v34, %v496_v30 }
  0xf3   : > { %2625 = vrot.lane.b32.xlu1 %v3345_v2, %s2808_s26  ;;  %v3427_v15 = vpack.i.bf16 %v529_v12, %v528_v7  ;;  %v1631_v58 = vsel %vm172_vm0, %v3131_v55, %v2203_v31  ;;  %v3435_v20 = vpack.i.bf16 %v545_v26, %v544_v9  ;;  %v1633_v32 = vsel %vm172_vm0, %v3135_v57, %v2208_v13 }
  0xf4   : > { %v3405_v21 = vsel %vm1671_vm3, %v1653_v24, %v2337_v52  ;;  %v3408_v17 = vsel %vm1671_vm3, %v1654_v42, %v2338_v19  ;;  %2630 = vrot.lane.b32.xlu0 %v2609_v29, %s2804_s22  ;;  %v561_v29 = vld [vmem:[#allocation2 + $0xb2] sm:$0xff]  ;;  %v2288_v19 = vunpack.i.h.bf16 %v3305_v14  ;;  %v2287_v52 = vunpack.i.l.bf16 %v3305_v14 }
  0xf5   : > { %v3413_v43 = vpop.permute.xlu1 %2345  ;;  %v1635_v54 = vsel %vm172_vm0, %v3149_v1, %v2213_v61  ;;  %v1634_v42 = vsel %vm172_vm0, %v3147_v0, %v2212_v63  ;;  %v1663_v57 = vsel %vm1638_vm2, %v1630_v10, %v2282_v40  ;;  %v2293_v34 = vunpack.i.h.bf16 %v3307_v50  ;;  %v576_v40 = vld [vmem:[#allocation2 + $0x16a] sm:$0xff] }
  0xf6   : > { %v3417_v48 = vpop.permute.xlu0 %2350  ;;  %v2292_v14 = vunpack.i.l.bf16 %v3307_v50  ;;  %v2218_v1 = vunpack.i.h.bf16 %v3250_v37  ;;  %v2217_v31 = vunpack.i.l.bf16 %v3250_v37  ;;  %v1666_v7 = vsel %vm1638_vm2, %v1633_v32, %v2288_v19 }
  0xf7   : > { %2635 = vrot.lane.b32.xlu1 %v3335_v62, %s2804_s22  ;;  %v3437_v62 = vpack.i.bf16 %v561_v29, %v560_v39  ;;  %v2297_v26 = vunpack.i.l.bf16 %v3312_v51  ;;  %v1668_v61 = vsel %vm1638_vm2, %v1635_v54, %v2293_v34  ;;  %v530_v34 = vld [vmem:[#allocation2 + $0xc1] sm:$0xff] }
  0xf8   : > { %2640 = vrot.lane.b32.xlu0 %v3343_v4, %s2805_s23  ;;  %v1632_v4 = vsel %vm172_vm0, %v3133_v56, %v2207_v59  ;;  %v1664_v56 = vsel %vm1638_vm2, %v1631_v58, %v2283_v36  ;;  %v2298_v59 = vunpack.i.h.bf16 %v3312_v51  ;;  %v1667_v29 = vsel %vm1638_vm2, %v1634_v42, %v2292_v14  ;;  %v577_v51 = vld [vmem:[#allocation2 + $0x172] sm:$0xff]  ;;  %v531_v14 = vld [vmem:[#allocation2 + $0xc9] sm:$0xff] }
  0xf9   : > { %v3433_v45 = vpop.permute.xlu1 %2355  ;;  %v1665_v12 = vsel %vm1638_vm2, %v1632_v4, %v2287_v52  ;;  %v1637_v10 = vsel %vm172_vm0, %v3153_v6, %v2218_v1  ;;  %v1636_v32 = vsel %vm172_vm0, %v3151_v3, %v2217_v31  ;;  %v3496_v42 = vpack.i.bf16 %v577_v51, %v576_v40  ;;  %v3502_v6 = vld [vmem:[#allocation2 + $0x180] sm:$0xff] }
  0xfa   : > { %v2361_v55 = vpop.permute.xlu0 %2360  ;;  %v1669_v54 = vsel %vm1638_vm2, %v1636_v32, %v2297_v26  ;;  %v546_v31 = vld [vmem:[#allocation2 + $0x181] sm:$0xff]  ;;  %v2223_v40 = vunpack.i.h.bf16 %v3252_v46  ;;  %v2222_v51 = vunpack.i.l.bf16 %v3252_v46  ;;  %v2303_v46 = vunpack.i.h.bf16 %v3314_v5 }
  0xfb   : > { %v2363_v24 = vunpack.i.h.bf16 %v2361_v55  ;;  %v2362_v30 = vunpack.i.l.bf16 %v2361_v55  ;;  %2645 = vrot.lane.b32.xlu1 %v3345_v2, %s2805_s23  ;;  %v1670_v55 = vsel %vm1638_vm2, %v1637_v10, %v2298_v59  ;;  %v294_v59 = vld [vmem:[#allocation2 + $0x8] sm:$0xff]  ;;  %v293_v26 = vld [vmem:[#allocation2] sm:$0xff]  ;;  %v2262_v10 = vunpack.i.l.bf16 %v3284_v60 }
  0xfc   : > { %2650 = vrot.lane.b32.xlu0 %v2649_v44, %s2806_s24 }
  0xfd   : > { %v3459_v0 = vsel %vm1671_vm3, %v1663_v57, %v2362_v30  ;;  %v3462_v28 = vsel %vm1671_vm3, %v1664_v56, %v2363_v24  ;;  %v2366_v2 = vpop.permute.xlu1 %2365  ;;  %v3498_v24 = vld [vmem:[#allocation2 + $0xc0] sm:$0xff]  ;;  %v3500_v30 = vld [vmem:[#allocation2 + $0xc8] sm:$0xff] }
  0xfe   : > { %v2368_v9 = vunpack.i.h.bf16 %v2366_v2  ;;  %v2367_v13 = vunpack.i.l.bf16 %v2366_v2  ;;  %v2371_v50 = vpop.permute.xlu0 %2370  ;;  %v3512_v56 = vld [vmem:[#allocation2 + $0x188] sm:$0xff]  ;;  %v2143_v2 = vunpack.i.h.bf16 %v3189_v33 }
  0xff   : > { %v2373_v39 = vunpack.i.h.bf16 %v2371_v50  ;;  %v2372_v37 = vunpack.i.l.bf16 %v2371_v50  ;;  %2655 = vrot.lane.b32.xlu1 %v3165_v11, %s2806_s24  ;;  %v563_v50 = vld [vmem:[#allocation2 + $0xca] sm:$0xff] }
 0x100   : > { %v3473_v63 = vsel %vm1671_vm3, %v1665_v12, %v2367_v13  ;;  %v3476_v36 = vsel %vm1671_vm3, %v1666_v7, %v2368_v9  ;;  %2660 = vrot.lane.b32.xlu0 %v3427_v15, %s2807_s25  ;;  %v2142_v7 = vunpack.i.l.bf16 %v3189_v33  ;;  %v547_v9 = vld [vmem:[#allocation2 + $0x189] sm:$0xff]  ;;  %v2183_v33 = vunpack.i.h.bf16 %v3220_v23 }
 0x101   : > { %v3481_v44 = vsel %vm1671_vm3, %v1667_v29, %v2372_v37  ;;  %v3484_v11 = vsel %vm1671_vm3, %v1668_v61, %v2373_v39  ;;  %v2376_v58 = vpop.permute.xlu1 %2375  ;;  %v562_v13 = vld [vmem:[#allocation2 + $0xc2] sm:$0xff]  ;;  %v2699_v39 = vpack.i.bf16 %v3500_v30, %v3498_v24  ;;  %v2704_v37 = vpack.i.bf16 %v3512_v56, %v3502_v6 }
 0x102   : > { %v2378_v4 = vunpack.i.h.bf16 %v2376_v58  ;;  %v2377_v19 = vunpack.i.l.bf16 %v2376_v58  ;;  %v3490_v52 = vpop.permute.xlu0 %2380  ;;  %v3524_v29 = vpack.i.bf16 %v531_v14, %v530_v34  ;;  %v2182_v61 = vunpack.i.l.bf16 %v3220_v23 }
 0x103   : > { %2665 = vrot.lane.b32.xlu1 %v3435_v20, %s2807_s25  ;;  %v2263_v58 = vunpack.i.h.bf16 %v3284_v60  ;;  %v1607_v23 = vsel %vm172_vm0, %v294_v59, %v2143_v2  ;;  %v2343_v24 = vunpack.i.h.bf16 %v3398_v18  ;;  %v2342_v60 = vunpack.i.l.bf16 %v3398_v18 }
 0x104   : > { %v3505_v3 = vsel %vm1671_vm3, %v1669_v54, %v2377_v19  ;;  %v3508_v57 = vsel %vm1671_vm3, %v1670_v55, %v2378_v4  ;;  %2670 = vrot.lane.b32.xlu0 %v3437_v62, %s2808_s26  ;;  %v3536_v4 = vpack.i.bf16 %v547_v9, %v546_v31  ;;  %v3538_v19 = vpack.i.bf16 %v563_v50, %v562_v13 }
 0x105   : > { %v3514_v1 = vpop.permute.xlu1 %2385  ;;  %v1606_v55 = vsel %vm172_vm0, %v293_v26, %v2142_v7  ;;  %v2302_v54 = vunpack.i.l.bf16 %v3314_v5  ;;  %v2383_v30 = vunpack.i.h.bf16 %v3490_v52  ;;  %v2382_v6 = vunpack.i.l.bf16 %v3490_v52 }
 0x106   : > { %v2391_v12 = vpop.permute.xlu0 %2390  ;;  %v1623_v56 = vsel %vm172_vm0, %v3114_v41, %v2183_v33  ;;  %v1622_v34 = vsel %vm172_vm0, %v3112_v38, %v2182_v61  ;;  %v1640_v5 = vsel %vm1638_vm2, %v1607_v23, %v2223_v40  ;;  %v1639_v14 = vsel %vm1638_vm2, %v1606_v55, %v2222_v51 }
 0x107   : > { %2675 = vrot.lane.b32.xlu1 %v3496_v42, %s2808_s26  ;;  %v1655_v18 = vsel %vm1638_vm2, %v1622_v34, %v2262_v10  ;;  %v1656_v52 = vsel %vm1638_vm2, %v1623_v56, %v2263_v58  ;;  %v2393_v31 = vunpack.i.h.bf16 %v2391_v12  ;;  %v2392_v2 = vunpack.i.l.bf16 %v2391_v12  ;;  %v579_v34 = vld [vmem:[#allocation2 + $0x18a] sm:$0xff] }
 0x108   : > { %2680 = vrot.lane.b32.xlu0 %v3427_v15, %s2804_s22  ;;  %v1672_v7 = vsel %vm1671_vm3, %v1639_v14, %v2302_v54  ;;  %v1673_v41 = vsel %vm1671_vm3, %v1640_v5, %v2303_v46  ;;  %v1688_v50 = vsel %vm1671_vm3, %v1655_v18, %v2342_v60  ;;  %v1689_v59 = vsel %vm1671_vm3, %v1656_v52, %v2343_v24 }
 0x109   : > { %v3534_v32 = vpop.permute.xlu1 %2395  ;;  %v1706_v26 = vsel %vm1704_vm4, %v1673_v41, %v2383_v30  ;;  %v2388_v12 = vunpack.i.h.bf16 %v3514_v1  ;;  %v2387_v33 = vunpack.i.l.bf16 %v3514_v1 }
 0x10a   : > { %v2401_v15 = vpop.permute.xlu0 %2400  ;;  %v1739_v58 = vsel %vm1737_vm5, %v1706_v26, %v2393_v31  ;;  %v2398_v10 = vunpack.i.h.bf16 %v3534_v32  ;;  %v2397_v23 = vunpack.i.l.bf16 %v3534_v32  ;;  %v578_v32 = vld [vmem:[#allocation2 + $0x182] sm:$0xff]  ;;  %v3598_v26 = vld [vmem:[#allocation2 + $0xd8] sm:$0xff] }
 0x10b   : > { %2685 = vrot.lane.b32.xlu1 %v3435_v20, %s2804_s22  ;;  %v2403_v9 = vunpack.i.h.bf16 %v2401_v15  ;;  %v2402_v38 = vunpack.i.l.bf16 %v2401_v15  ;;  %v1722_v56 = vsel %vm1704_vm4, %v1689_v59, %v2388_v12  ;;  %v3600_v12 = vld [vmem:[#allocation2 + $0xe0] sm:$0xff] }
 0x10c   : > { %2690 = vrot.lane.b32.xlu0 %v3437_v62, %s2805_s23  ;;  %v1705_v62 = vsel %vm1704_vm4, %v1672_v7, %v2382_v6  ;;  %v1721_v6 = vsel %vm1704_vm4, %v1688_v50, %v2387_v33  ;;  %v1755_v52 = vsel %vm1737_vm5, %v1722_v56, %v2398_v10  ;;  %v3602_v33 = vld [vmem:[#allocation2 + $0x198] sm:$0xff]  ;;  %v3612_v10 = vld [vmem:[#allocation2 + $0xe1] sm:$0xff]  ;;  %v2188_v56 = vunpack.i.h.bf16 %v3226_v53 }
 0x10d   : > { %v2406_v20 = vpop.permute.xlu1 %2405  ;;  %v1738_v51 = vsel %vm1737_vm5, %v1705_v62, %v2392_v2  ;;  %v1754_v18 = vsel %vm1737_vm5, %v1721_v6, %v2397_v23  ;;  %v2148_v23 = vunpack.i.h.bf16 %v3197_v22  ;;  %v3634_v6 = vld [vmem:[#allocation2 + $0xe2] sm:$0xff] }
 0x10e   : > { %v2411_v13 = vpop.permute.xlu0 %2410  ;;  %v1771_v46 = vsel %vm1770_vm6, %v1738_v51, %v2402_v38  ;;  %v2408_v54 = vunpack.i.h.bf16 %v2406_v20  ;;  %v2407_v15 = vunpack.i.l.bf16 %v2406_v20  ;;  %v3608_v51 = vld [vmem:[#allocation2 + $0x1a0] sm:$0xff] }
 0x10f   : > { %2695 = vrot.lane.b32.xlu1 %v3496_v42, %s2805_s23  ;;  %v2413_v61 = vunpack.i.h.bf16 %v2411_v13  ;;  %v2412_v40 = vunpack.i.l.bf16 %v2411_v13  ;;  %v1772_v42 = vsel %vm1770_vm6, %v1739_v58, %v2403_v9  ;;  %v3594_v13 = vpack.i.bf16 %v579_v34, %v578_v32  ;;  %v3610_v58 = vld [vmem:[#allocation2 + $0xd9] sm:$0xff]  ;;  %v3982_v34 = vld [vmem:[#allocation11_spill] sm:$0xff] }
 0x110   : > { %2700 = vrot.lane.b32.xlu0 %v2699_v39, %s2806_s24  ;;  %v1787_v20 = vsel %vm1770_vm6, %v1754_v18, %v2407_v15  ;;  %v1788_v7 = vsel %vm1770_vm6, %v1755_v52, %v2408_v54  ;;  %v3618_v15 = vld [vmem:[#allocation2 + $0x199] sm:$0xff]  ;;  %v2187_v32 = vunpack.i.l.bf16 %v3226_v53  ;;  %v3983_v18 = vld [vmem:[#allocation3_spill] sm:$0xff] }
 0x111   : > { %v2416_v55 = vpop.permute.xlu1 %2415  ;;  %v1804_v5 = vsel %vm1803_vm7, %v1771_v46, %v2412_v40  ;;  %v1805_v14 = vsel %vm1803_vm7, %v1772_v42, %v2413_v61  ;;  %v3986_v53 = vld [vmem:[#allocation17_spill] sm:$0xff] }
 0x112   : > { %v2421_v1 = vpop.permute.xlu0 %2420  ;;  %v2418_v24 = vunpack.i.h.bf16 %v2416_v55  ;;  %v2417_v60 = vunpack.i.l.bf16 %v2416_v55  ;;  %v2147_v55 = vunpack.i.l.bf16 %v3197_v22  ;;  %v2759_v22 = vpack.i.bf16 %v3612_v10, %v3610_v58 }
 0x113   : > { %v2423_v30 = vunpack.i.h.bf16 %v2421_v1  ;;  %v2422_v39 = vunpack.i.l.bf16 %v2421_v1  ;;  %2705 = vrot.lane.b32.xlu1 %v2704_v37, %s2806_s24 }
 0x114   : > { %2710 = vrot.lane.b32.xlu0 %v3524_v29, %s2807_s25  ;;  %v1820_v50 = vsel %vm1803_vm7, %v1787_v20, %v2417_v60  ;;  %v1821_v59 = vsel %vm1803_vm7, %v1788_v7, %v2418_v24  ;;  %v2749_v24 = vpack.i.bf16 %v3600_v12, %v3598_v26  ;;  %v2754_v60 = vpack.i.bf16 %v3608_v51, %v3602_v33 }
 0x115   : > { %v2426_v31 = vpop.permute.xlu1 %2425  ;;  %v1837_v37 = vsel %vm1836_vm8, %v1804_v5, %v2422_v39  ;;  %v1838_v2 = vsel %vm1836_vm8, %v1805_v14, %v2423_v30  ;;  %v3630_v30 = vld [vmem:[#allocation2 + $0x1a1] sm:$0xff]  ;;  %v2228_v5 = vunpack.i.h.bf16 %v3982_v34  ;;  %v2227_v14 = vunpack.i.l.bf16 %v3982_v34 }
 0x116   : > { %v2428_v41 = vunpack.i.h.bf16 %v2426_v31  ;;  %v2427_v9 = vunpack.i.l.bf16 %v2426_v31  ;;  %v3590_v38 = vpop.permute.xlu0 %2430  ;;  %v1874_v62 = vpack.c.bf16 %v1838_v2, %v1837_v37  ;;  %v3632_v39 = vld [vmem:[#allocation2 + $0xda] sm:$0xff]  ;;  %v1608_v52 = vsel %vm172_vm0, %v3983_v18, %v2147_v55  ;;  %v3985_v2 = vld [vmem:[#allocation14_spill] sm:$0xff] }
 0x117   : > { %2715 = vrot.lane.b32.xlu1 %v3536_v4, %s2807_s25  ;;  %v3984_v31 = vld [vmem:[#allocation4_spill] sm:$0xff]  ;;  %v2268_v20 = vunpack.i.h.bf16 %v3985_v2  ;;  %v2267_v7 = vunpack.i.l.bf16 %v3985_v2  ;;  %v2348_v26 = vunpack.i.h.bf16 %v3413_v43  ;;  %v2347_v12 = vunpack.i.l.bf16 %v3413_v43 }
 0x118   : > { %2720 = vrot.lane.b32.xlu0 %v3538_v19, %s2808_s26  ;;  %v1853_v61 = vsel %vm1836_vm8, %v1820_v50, %v2427_v9  ;;  %v1854_v40 = vsel %vm1836_vm8, %v1821_v59, %v2428_v41  ;;  %v1933_v1 = vsel %vm1928_vm9, %v1874_v62, 0  ;;  %v1609_v37 = vsel %vm172_vm0, %v3984_v31, %v2148_v23  ;;  %v3987_v23 = vld [vmem:[#allocation6_spill] sm:$0xff] }
 0x119   : > { %v3616_v46 = vpop.permute.xlu1 %2435  ;;  %v1882_v42 = vpack.c.bf16 %v1854_v40, %v1853_v61  ;;  %v2308_v9 = vunpack.i.h.bf16 %v3986_v53  ;;  %v2307_v50 = vunpack.i.l.bf16 %v3986_v53  ;;  %v2769_v62 = vpack.i.bf16 %v3634_v6, %v3632_v39  ;;  %v3991_v39 = vld [vmem:[#allocation12_spill] sm:$0xff] }
 0x11a   : > { %v2441_v54 = vpop.permute.xlu0 %2440  ;;  %v2433_v61 = vunpack.i.h.bf16 %v3590_v38  ;;  %v2432_v40 = vunpack.i.l.bf16 %v3590_v38  ;;  %v1625_v55 = vsel %vm172_vm0, %v3987_v23, %v2188_v56  ;;  %v1641_v34 = vsel %vm1638_vm2, %v1608_v52, %v2227_v14 }
 0x11b   : > { %2725 = vrot.lane.b32.xlu1 %v3594_v13, %s2808_s26  ;;  %2113 = vmatprep.subr.msk.bf16.mxu0 %vm1928_vm9, %v1882_v42  ;;  %v3988_v42 = vld [vmem:[#allocation5_spill] sm:$0xff]  ;;  %v1642_v18 = vsel %vm1638_vm2, %v1609_v37, %v2228_v5  ;;  %v1658_v43 = vsel %vm1638_vm2, %v1625_v55, %v2268_v20  ;;  %v2443_v31 = vunpack.i.h.bf16 %v2441_v54  ;;  %v2442_v2 = vunpack.i.l.bf16 %v2441_v54 }
 0x11c   : > { %2730 = vrot.lane.b32.xlu0 %v3524_v29, %s2804_s22  ;;  %2096 = vmatpush3.bf16.xpose.msra.mxu0 %v1933_v1  ;;  %v2764_v29 = vpack.i.bf16 %v3630_v30, %v3618_v15  ;;  %v1624_v1 = vsel %vm172_vm0, %v3988_v42, %v2187_v32  ;;  %v1674_v53 = vsel %vm1671_vm3, %v1641_v34, %v2307_v50  ;;  %v2438_v54 = vunpack.i.h.bf16 %v3616_v46 }
 0x11d   : > { %v2446_v41 = vpop.permute.xlu1 %2445  ;;  %v1657_v38 = vsel %vm1638_vm2, %v1624_v1, %v2267_v7  ;;  %v1675_v56 = vsel %vm1671_vm3, %v1642_v18, %v2308_v9  ;;  %v1691_v5 = vsel %vm1671_vm3, %v1658_v43, %v2348_v26  ;;  %v2437_v37 = vunpack.i.l.bf16 %v3616_v46 }
 0x11e   : > { %v2451_v59 = vpop.permute.xlu0 %2450  ;;  %v1690_v14 = vsel %vm1671_vm3, %v1657_v38, %v2347_v12  ;;  %v1708_v52 = vsel %vm1704_vm4, %v1675_v56, %v2433_v61  ;;  %v2447_v26 = vunpack.i.l.bf16 %v2446_v41  ;;  %v2233_v6 = vunpack.i.h.bf16 %v3991_v39 }
 0x11f   : > { %2735 = vrot.lane.b32.xlu1 %v3536_v4, %s2804_s22  ;;  %v2453_v23 = vunpack.i.h.bf16 %v2451_v59  ;;  %v2452_v32 = vunpack.i.l.bf16 %v2451_v59  ;;  %v1741_v50 = vsel %vm1737_vm5, %v1708_v52, %v2443_v31  ;;  %v2448_v59 = vunpack.i.h.bf16 %v2446_v41 }
 0x120   : > { %2740 = vrot.lane.b32.xlu0 %v3538_v19, %s2805_s23  ;;  %v1707_v19 = vsel %vm1704_vm4, %v1674_v53, %v2432_v40  ;;  %v1724_v41 = vsel %vm1704_vm4, %v1691_v5, %v2438_v54 }
 0x121   : > { %v2456_v4 = vpop.permute.xlu1 %2455  ;;  %v1740_v9 = vsel %vm1737_vm5, %v1707_v19, %v2442_v2  ;;  %v1774_v40 = vsel %vm1770_vm6, %v1741_v50, %v2453_v23  ;;  %v580_v2 = vld [vmem:[#allocation2 + $0x19a] sm:$0xff]  ;;  %v1757_v33 = vsel %vm1737_vm5, %v1724_v41, %v2448_v59 }
 0x122   : > { %v2461_v42 = vpop.permute.xlu0 %2460  ;;  %v1773_v61 = vsel %vm1770_vm6, %v1740_v9, %v2452_v32  ;;  %v2457_v55 = vunpack.i.l.bf16 %v2456_v4 }
 0x123   : > { %2745 = vrot.lane.b32.xlu1 %v3594_v13, %s2805_s23  ;;  %v2463_v20 = vunpack.i.h.bf16 %v2461_v42  ;;  %v2462_v7 = vunpack.i.l.bf16 %v2461_v42  ;;  %v2458_v13 = vunpack.i.h.bf16 %v2456_v4  ;;  %v581_v4 = vld [vmem:[#allocation2 + $0x1a2] sm:$0xff] }
 0x124   : > { %2750 = vrot.lane.b32.xlu0 %v2749_v24, %s2806_s24  ;;  %v1723_v24 = vsel %vm1704_vm4, %v1690_v14, %v2437_v37  ;;  %v3989_v37 = vld [vmem:[#allocation7_spill] sm:$0xff] }
 0x125   : > { %v2466_v12 = vpop.permute.xlu1 %2465  ;;  %v1806_v38 = vsel %vm1803_vm7, %v1773_v61, %v2462_v7  ;;  %v1807_v31 = vsel %vm1803_vm7, %v1774_v40, %v2463_v20  ;;  %v1756_v53 = vsel %vm1737_vm5, %v1723_v24, %v2447_v26  ;;  %v1790_v32 = vsel %vm1770_vm6, %v1757_v33, %v2458_v13  ;;  %v3992_v40 = vld [vmem:[#allocation15_spill] sm:$0xff] }
 0x126   : > { %v2471_v1 = vpop.permute.xlu0 %2470  ;;  %v2468_v34 = vunpack.i.h.bf16 %v2466_v12  ;;  %v2467_v46 = vunpack.i.l.bf16 %v2466_v12  ;;  %v1789_v23 = vsel %vm1770_vm6, %v1756_v53, %v2457_v55  ;;  %v2152_v20 = vunpack.i.l.bf16 %v3989_v37  ;;  %v2784_v12 = vld [vmem:[#allocation2 + $0x30] sm:$0xff] }
 0x127   : > { %v2473_v18 = vunpack.i.h.bf16 %v2471_v1  ;;  %v2472_v43 = vunpack.i.l.bf16 %v2471_v1  ;;  %2755 = vrot.lane.b32.xlu1 %v2754_v60, %s2806_s24  ;;  %v2153_v50 = vunpack.i.h.bf16 %v3989_v37  ;;  %v2273_v13 = vunpack.i.h.bf16 %v3992_v40 }
 0x128   : > { %2760 = vrot.lane.b32.xlu0 %v2759_v22, %s2807_s25  ;;  %v1822_v58 = vsel %vm1803_vm7, %v1789_v23, %v2467_v46  ;;  %v1823_v10 = vsel %vm1803_vm7, %v1790_v32, %v2468_v34  ;;  %v2774_v22 = vpack.i.bf16 %v581_v4, %v580_v2  ;;  %v1610_v61 = vsel %vm172_vm0, %v2784_v12, %v2152_v20  ;;  %v2785_v34 = vld [vmem:[#allocation2 + $0x38] sm:$0xff] }
 0x129   : > { %v2476_v51 = vpop.permute.xlu1 %2475  ;;  %v1839_v60 = vsel %vm1836_vm8, %v1806_v38, %v2472_v43  ;;  %v1840_v56 = vsel %vm1836_vm8, %v1807_v31, %v2473_v18  ;;  %v2272_v55 = vunpack.i.l.bf16 %v3992_v40  ;;  %v1611_v46 = vsel %vm172_vm0, %v2785_v34, %v2153_v50  ;;  %v3993_v18 = vld [vmem:[#allocation18_spill] sm:$0xff]  ;;  %v1890_v38 = vld [vmem:[%s3947_s2] sm:$0xff] }
 0x12a   : > { %v2478_v42 = vunpack.i.h.bf16 %v2476_v51  ;;  %v2477_v14 = vunpack.i.l.bf16 %v2476_v51  ;;  %v2481_v5 = vpop.permute.xlu0 %2480  ;;  %v1875_v19 = vpack.c.bf16 %v1840_v56, %v1839_v60  ;;  %v2313_v43 = vunpack.i.h.bf16 %v3993_v18  ;;  %v2786_v51 = vld [vmem:[#allocation2 + $0xf8] sm:$0xff]  ;;  %v2787_v56 = vld [vmem:[#allocation2 + $0xf0] sm:$0xff] }
 0x12b   : > { %2765 = vrot.lane.b32.xlu1 %v2764_v29, %s2807_s25  ;;  %v3990_v29 = vld [vmem:[#allocation9_spill] sm:$0xff]  ;;  %v2312_v24 = vunpack.i.l.bf16 %v3993_v18  ;;  %v2353_v31 = vunpack.i.h.bf16 %v3417_v48  ;;  %v2352_v2 = vunpack.i.l.bf16 %v3417_v48  ;;  %v2483_v4 = vunpack.i.h.bf16 %v2481_v5 }
 0x12c   : > { %v1855_v52 = vsel %vm1836_vm8, %v1822_v58, %v2477_v14  ;;  %v1856_v54 = vsel %vm1836_vm8, %v1823_v10, %v2478_v42  ;;  %2770 = vrot.lane.b32.xlu0 %v2769_v62, %s2808_s26  ;;  %v1936_v30 = vsel %vm1928_vm9, %v1875_v19, 0  ;;  %v2193_v59 = vunpack.i.h.bf16 %v3990_v29 }
 0x12d   : > { %v1883_v7 = vpack.c.bf16 %v1856_v54, %v1855_v52  ;;  %v3716_v9 = vpop.permute.xlu1 %2485  ;;  %v2192_v26 = vunpack.i.l.bf16 %v3990_v29  ;;  %v2232_v62 = vunpack.i.l.bf16 %v3991_v39  ;;  %v2482_v53 = vunpack.i.l.bf16 %v2481_v5 }
 0x12e   : > { %v2491_v15 = vpop.permute.xlu0 %2490  ;;  %v2809_v33 = vmov 0   ;;  %v1627_v60 = vsel %vm172_vm0, %v2786_v51, %v2193_v59  ;;  %v1644_v32 = vsel %vm1638_vm2, %v1611_v46, %v2233_v6  ;;  %v2488_v29 = vunpack.i.h.bf16 %v3716_v9 }
 0x12f   : > { %2775 = vrot.lane.b32.xlu1 %v2774_v22, %s2808_s26  ;;  %2114 = vmatprep.subr.msk.bf16.mxu0 %vm1928_vm9, %v1883_v7  ;;  %v1626_v23 = vsel %vm172_vm0, %v2787_v56, %v2192_v26  ;;  %v1643_v42 = vsel %vm1638_vm2, %v1610_v61, %v2232_v62  ;;  %v1660_v48 = vsel %vm1638_vm2, %v1627_v60, %v2273_v13  ;;  %v2493_v58 = vunpack.i.h.bf16 %v2491_v15 }
 0x130   : > { %2098 = vmatpush3.bf16.xpose.msra.mxu0 %v1936_v30  ;;  %2779 = vset.pattern.permute.xlu1 %v2809_v33  ;;  %v1659_v14 = vsel %vm1638_vm2, %v1626_v23, %v2272_v55  ;;  %v2492_v5 = vunpack.i.l.bf16 %v2491_v15  ;;  %v1676_v22 = vsel %vm1671_vm3, %v1643_v42, %v2312_v24  ;;  %v1677_v19 = vsel %vm1671_vm3, %v1644_v32, %v2313_v43 }
 0x131   : > { %v2496_v1 = vpop.permute.xlu1 %2495  ;;  %v1692_v20 = vsel %vm1671_vm3, %v1659_v14, %v2352_v2  ;;  %v1693_v7 = vsel %vm1671_vm3, %v1660_v48, %v2353_v31  ;;  %v1709_v50 = vsel %vm1704_vm4, %v1676_v22, %v2482_v53  ;;  %v1710_v30 = vsel %vm1704_vm4, %v1677_v19, %v2483_v4 }
 0x132   : > { %v2501_v41 = vpop.permute.xlu0 %2500  ;;  %v2487_v15 = vunpack.i.l.bf16 %v3716_v9  ;;  %v1742_v39 = vsel %vm1737_vm5, %v1709_v50, %v2492_v5  ;;  %v1743_v6 = vsel %vm1737_vm5, %v1710_v30, %v2493_v58  ;;  %v2498_v62 = vunpack.i.h.bf16 %v2496_v1  ;;  %v3995_v30 = vld [vmem:[#allocation10_spill] sm:$0xff] }
 0x133   : > { %1893 = vperm.xlu1 %2779, %v1890_v38   ;;  %v2503_v52 = vunpack.i.h.bf16 %v2501_v41  ;;  %v2502_v54 = vunpack.i.l.bf16 %v2501_v41  ;;  %v2497_v12 = vunpack.i.l.bf16 %v2496_v1  ;;  %v1726_v38 = vsel %vm1704_vm4, %v1693_v7, %v2488_v29 }
 0x134   : > { %v1725_v41 = vsel %vm1704_vm4, %v1692_v20, %v2487_v15  ;;  %v1759_v4 = vsel %vm1737_vm5, %v1726_v38, %v2498_v62  ;;  %v2198_v29 = vunpack.i.h.bf16 %v3995_v30  ;;  %v2197_v15 = vunpack.i.l.bf16 %v3995_v30 }
 0x135   : > { %v2506_v10 = vpop.permute.xlu1 %2505  ;;  %v1775_v40 = vsel %vm1770_vm6, %v1742_v39, %v2502_v54  ;;  %v1776_v13 = vsel %vm1770_vm6, %v1743_v6, %v2503_v52  ;;  %v1758_v2 = vsel %vm1737_vm5, %v1725_v41, %v2497_v12  ;;  %v3994_v54 = vld [vmem:[#allocation8_spill] sm:$0xff]  ;;  %v2357_v41 = vunpack.i.l.bf16 %v3433_v45 }
 0x136   : > { %v2511_v37 = vpop.permute.xlu0 %2510  ;;  %v2508_v55 = vunpack.i.h.bf16 %v2506_v10  ;;  %v2507_v34 = vunpack.i.l.bf16 %v2506_v10  ;;  %v2157_v20 = vunpack.i.l.bf16 %v3994_v54  ;;  %v3997_v6 = vld [vmem:[#allocation16_spill] sm:$0xff] }
 0x137   : > { %v2513_v59 = vunpack.i.h.bf16 %v2511_v37  ;;  %v2512_v26 = vunpack.i.l.bf16 %v2511_v37  ;;  %v2158_v37 = vunpack.i.h.bf16 %v3994_v54  ;;  %v2278_v62 = vunpack.i.h.bf16 %v3997_v6 }
 0x138   : > { %v1791_v56 = vsel %vm1770_vm6, %v1758_v2, %v2507_v34  ;;  %v1792_v23 = vsel %vm1770_vm6, %v1759_v4, %v2508_v55  ;;  %v2277_v12 = vunpack.i.l.bf16 %v3997_v6  ;;  %v2789_v55 = vld [vmem:[#allocation2 + $0x48] sm:$0xff] }
 0x139   : > { %v2516_v61 = vpop.permute.xlu1 %2515  ;;  %v1808_v31 = vsel %vm1803_vm7, %v1775_v40, %v2512_v26  ;;  %v1809_v1 = vsel %vm1803_vm7, %v1776_v13, %v2513_v59  ;;  %v3996_v59 = vld [vmem:[#allocation13_spill] sm:$0xff]  ;;  %v2788_v40 = vld [vmem:[#allocation2 + $0x50] sm:$0xff]  ;;  %v1612_v34 = vsel %vm172_vm0, %v2789_v55, %v2157_v20  ;;  %v2791_v4 = vld [vmem:[#allocation2 + $0x108] sm:$0xff] }
 0x13a   : > { %v2521_v46 = vpop.permute.xlu0 %2520  ;;  %v2518_v18 = vunpack.i.h.bf16 %v2516_v61  ;;  %v2517_v43 = vunpack.i.l.bf16 %v2516_v61  ;;  %v2238_v26 = vunpack.i.h.bf16 %v3996_v59  ;;  %v2237_v39 = vunpack.i.l.bf16 %v3996_v59 }
 0x13b   : > { %v2523_v24 = vunpack.i.h.bf16 %v2521_v46  ;;  %v2522_v9 = vunpack.i.l.bf16 %v2521_v46  ;;  %v1613_v13 = vsel %vm172_vm0, %v2788_v40, %v2158_v37  ;;  %v2318_v46 = vunpack.i.h.bf16 %v3341_v8 }
 0x13c   : > { %v1824_v48 = vsel %vm1803_vm7, %v1791_v56, %v2517_v43  ;;  %v1825_v58 = vsel %vm1803_vm7, %v1792_v23, %v2518_v18  ;;  %v2317_v18 = vunpack.i.l.bf16 %v3341_v8  ;;  %v1645_v8 = vsel %vm1638_vm2, %v1612_v34, %v2237_v39 }
 0x13d   : > { %v2526_v53 = vpop.permute.xlu1 %2525  ;;  %v1841_v51 = vsel %vm1836_vm8, %v1808_v31, %v2522_v9  ;;  %v1842_v60 = vsel %vm1836_vm8, %v1809_v1, %v2523_v24  ;;  %v2781_v24 = vld [vmem:[%s3946_s1] sm:$0xff]   ;;  %v2358_v9 = vunpack.i.h.bf16 %v3433_v45  ;;  %v2790_v1 = vld [vmem:[#allocation2 + $0x110] sm:$0xff] }
 0x13e   : > { %v2528_v32 = vunpack.i.h.bf16 %v2526_v53  ;;  %v2527_v42 = vunpack.i.l.bf16 %v2526_v53  ;;  %v2531_v14 = vpop.permute.xlu0 %2530  ;;  %v1876_v5 = vpack.c.bf16 %v1842_v60, %v1841_v51  ;;  %v1629_v2 = vsel %vm172_vm0, %v2790_v1, %v2198_v29 }
 0x13f   : > { %v2533_v38 = vunpack.i.h.bf16 %v2531_v14  ;;  %v2532_v31 = vunpack.i.l.bf16 %v2531_v14  ;;  %v1628_v53 = vsel %vm172_vm0, %v2791_v4, %v2197_v15  ;;  %v1646_v51 = vsel %vm1638_vm2, %v1613_v13, %v2238_v26 }
 0x140   : > { %v1857_v10 = vsel %vm1836_vm8, %v1824_v48, %v2527_v42  ;;  %v1858_v22 = vsel %vm1836_vm8, %v1825_v58, %v2528_v32  ;;  %v1939_v50 = vsel %vm1928_vm9, %v1876_v5, 0  ;;  %v1662_v60 = vsel %vm1638_vm2, %v1629_v2, %v2278_v62 }
 0x141   : > { %v1884_v19 = vpack.c.bf16 %v1858_v22, %v1857_v10  ;;  %v3770_v52 = vpop.permute.xlu1 %2535  ;;  %v1661_v56 = vsel %vm1638_vm2, %v1628_v53, %v2277_v12  ;;  %v1678_v45 = vsel %vm1671_vm3, %v1645_v8, %v2317_v18  ;;  %v1679_v14 = vsel %vm1671_vm3, %v1646_v51, %v2318_v46  ;;  %v2782_v10 = vld [vmem:[%s3946_s1 + $0x8] sm:$0xff]  }
 0x142   : > { %v2541_v7 = vpop.permute.xlu0 %2540  ;;  %v1694_v22 = vsel %vm1671_vm3, %v1661_v56, %v2357_v41  ;;  %v1712_v54 = vsel %vm1704_vm4, %v1679_v14, %v2533_v38  ;;  %v1711_v37 = vsel %vm1704_vm4, %v1678_v45, %v2532_v31  ;;  %v2538_v20 = vunpack.i.h.bf16 %v3770_v52 }
 0x143   : > { %2115 = vmatprep.subr.msk.bf16.mxu0 %vm1928_vm9, %v1884_v19  ;;  %v2543_v23 = vunpack.i.h.bf16 %v2541_v7  ;;  %v2542_v32 = vunpack.i.l.bf16 %v2541_v7  ;;  %v1695_v19 = vsel %vm1671_vm3, %v1662_v60, %v2358_v9  ;;  %v2537_v7 = vunpack.i.l.bf16 %v3770_v52  ;;  %v2783_v52 = vld [vmem:[%s3946_s1 + $0x10] ss:$0 sps:$4 sm:$0x33]  }
 0x144   : > { %2100 = vmatpush3.bf16.xpose.msra.mxu0 %v1939_v50 }
 0x145   : > { %v2546_v61 = vpop.permute.xlu1 %2545  ;;  %v1744_v29 = vsel %vm1737_vm5, %v1711_v37, %v2542_v32  ;;  %v1745_v15 = vsel %vm1737_vm5, %v1712_v54, %v2543_v23 }
 0x146   : > { %v2551_v43 = vpop.permute.xlu0 %2550  ;;  %v2548_v59 = vunpack.i.h.bf16 %v2546_v61  ;;  %v2547_v26 = vunpack.i.l.bf16 %v2546_v61  ;;  %v1728_v61 = vsel %vm1704_vm4, %v1695_v19, %v2538_v20 }
 0x147   : > { %v2553_v48 = vunpack.i.h.bf16 %v2551_v43  ;;  %v2552_v58 = vunpack.i.l.bf16 %v2551_v43  ;;  %v1727_v43 = vsel %vm1704_vm4, %v1694_v22, %v2537_v7 }
 0x148   : > { %v1760_v41 = vsel %vm1737_vm5, %v1727_v43, %v2547_v26  ;;  %v1761_v38 = vsel %vm1737_vm5, %v1728_v61, %v2548_v59 }
 0x149   : > { %v2556_v42 = vpop.permute.xlu1 %2555  ;;  %v1777_v6 = vsel %vm1770_vm6, %v1744_v29, %v2552_v58  ;;  %v1778_v62 = vsel %vm1770_vm6, %v1745_v15, %v2553_v48 }
 0x14a   : > { %1912 = vxpose.xlu0.c.b16.start [1/3] (short) (narrow) %v2781_v24, 16  ;;  %v2561_v5 = vpop.permute.xlu0 %2560  ;;  %v2558_v12 = vunpack.i.h.bf16 %v2556_v42  ;;  %v2557_v40 = vunpack.i.l.bf16 %v2556_v42 }
 0x14b   : > { %v2563_v50 = vunpack.i.h.bf16 %v2561_v5  ;;  %v2562_v30 = vunpack.i.l.bf16 %v2561_v5 }
 0x14c   : > { %v1793_v4 = vsel %vm1770_vm6, %v1760_v41, %v2557_v40  ;;  %v1794_v53 = vsel %vm1770_vm6, %v1761_v38, %v2558_v12 }
 0x14d   : > { %v2566_v39 = vpop.permute.xlu1 %2565  ;;  %v1810_v24 = vsel %vm1803_vm7, %v1777_v6, %v2562_v30  ;;  %v1811_v9 = vsel %vm1803_vm7, %v1778_v62, %v2563_v50 }
 0x14e   : > { %1913 = vxpose.xlu0.c.b16.cont [2/3] (short) (narrow) %v2782_v10, 16  ;;  %v2571_v13 = vpop.permute.xlu0 %2570  ;;  %v2568_v55 = vunpack.i.h.bf16 %v2566_v39  ;;  %v2567_v34 = vunpack.i.l.bf16 %v2566_v39 }
 0x14f   : > { %v2573_v46 = vunpack.i.h.bf16 %v2571_v13  ;;  %v2572_v18 = vunpack.i.l.bf16 %v2571_v13 }
 0x150   : > { %v1826_v56 = vsel %vm1803_vm7, %v1793_v4, %v2567_v34  ;;  %v1827_v23 = vsel %vm1803_vm7, %v1794_v53, %v2568_v55 }
 0x151   : > { %v2576_v31 = vpop.permute.xlu1 %2575  ;;  %v1843_v1 = vsel %vm1836_vm8, %v1810_v24, %v2572_v18  ;;  %v1844_v2 = vsel %vm1836_vm8, %v1811_v9, %v2573_v46 }
 0x152   : > { %v2578_v51 = vunpack.i.h.bf16 %v2576_v31  ;;  %v2577_v8 = vunpack.i.l.bf16 %v2576_v31  ;;  %1914 = vxpose.xlu0.c.b16.end [3/3] (short) (narrow) %v2783_v52, 16  ;;  %v2581_v60 = vpop.permute.xlu0 %2580  ;;  %v1877_v32 = vpack.c.bf16 %v1844_v2, %v1843_v1 }
 0x153   : > { %v2583_v19 = vunpack.i.h.bf16 %v2581_v60  ;;  %v2582_v54 = vunpack.i.l.bf16 %v2581_v60 }
 0x154   : > { %v1859_v42 = vsel %vm1836_vm8, %v1826_v56, %v2577_v8  ;;  %v1860_v45 = vsel %vm1836_vm8, %v1827_v23, %v2578_v51  ;;  %v1942_v5 = vsel %vm1928_vm9, %v1877_v32, 0 }
 0x155   : > { %v1885_v14 = vpack.c.bf16 %v1860_v45, %v1859_v42  ;;  %v2586_v48 = vpop.permute.xlu1 %2585  ;;  %v1713_v59 = vsel %vm1704_vm4, %v3367_v27, %v2582_v54  ;;  %v1714_v26 = vsel %vm1704_vm4, %v3370_v47, %v2583_v19 }
 0x156   : > { %v2591_v58 = vpop.permute.xlu0 %2590  ;;  %v2587_v50 = vunpack.i.l.bf16 %v2586_v48  ;;  %v2588_v39 = vunpack.i.h.bf16 %v2586_v48 }
 0x157   : > { %2116 = vmatprep.subr.msk.bf16.mxu0 %vm1928_vm9, %v1885_v14  ;;  %v2593_v37 = vunpack.i.h.bf16 %v2591_v58  ;;  %v2592_v20 = vunpack.i.l.bf16 %v2591_v58 }
 0x158   : > { %2102 = vmatpush3.bf16.xpose.msra.mxu0 %v1942_v5  ;;  %v1729_v34 = vsel %vm1704_vm4, %v3459_v0, %v2587_v50  ;;  %v1730_v41 = vsel %vm1704_vm4, %v3462_v28, %v2588_v39 }
 0x159   : > { %v2596_v10 = vpop.permute.xlu1 %2595  ;;  %v1746_v40 = vsel %vm1737_vm5, %v1713_v59, %v2592_v20 }
 0x15a   : > { %v2601_v22 = vpop.permute.xlu0 %2600  ;;  %v2597_v6 = vunpack.i.l.bf16 %v2596_v10  ;;  %v2598_v13 = vunpack.i.h.bf16 %v2596_v10 }
 0x15b   : > { %2780 = vset.pattern.permute.xlu0 %v2809_v33  ;;  %v2603_v30 = vunpack.i.h.bf16 %v2601_v22  ;;  %v2602_v29 = vunpack.i.l.bf16 %v2601_v22  ;;  %v1747_v33 = vsel %vm1737_vm5, %v1714_v26, %v2593_v37 }
 0x15c   : > { %v1762_v38 = vsel %vm1737_vm5, %v1729_v34, %v2597_v6  ;;  %v1763_v0 = vsel %vm1737_vm5, %v1730_v41, %v2598_v13 }
 0x15d   : > { %v2606_v7 = vpop.permute.xlu1 %2605  ;;  %v1779_v46 = vsel %vm1770_vm6, %v1746_v40, %v2602_v29  ;;  %v1780_v27 = vsel %vm1770_vm6, %v1747_v33, %v2603_v30 }
 0x15e   : > { %v2611_v15 = vpop.permute.xlu0 %2610  ;;  %v2607_v52 = vunpack.i.l.bf16 %v2606_v7  ;;  %v2608_v18 = vunpack.i.h.bf16 %v2606_v7 }
 0x15f   : > { %v2613_v62 = vunpack.i.h.bf16 %v2611_v15  ;;  %v2612_v12 = vunpack.i.l.bf16 %v2611_v15 }
 0x160   : > { %v1795_v2 = vsel %vm1770_vm6, %v1762_v38, %v2607_v52  ;;  %v1796_v8 = vsel %vm1770_vm6, %v1763_v0, %v2608_v18 }
 0x161   : > { %v2616_v55 = vpop.permute.xlu1 %2615  ;;  %v1812_v31 = vsel %vm1803_vm7, %v1779_v46, %v2612_v12  ;;  %v1813_v1 = vsel %vm1803_vm7, %v1780_v27, %v2613_v62 }
 0x162   : > { %v2621_v47 = vpop.permute.xlu0 %2620  ;;  %v2618_v43 = vunpack.i.h.bf16 %v2616_v55  ;;  %v2617_v61 = vunpack.i.l.bf16 %v2616_v55 }
 0x163   : > { %v2623_v24 = vunpack.i.h.bf16 %v2621_v47  ;;  %v2622_v9 = vunpack.i.l.bf16 %v2621_v47 }
 0x164   : > { %v1828_v32 = vsel %vm1803_vm7, %v1795_v2, %v2617_v61  ;;  %v1829_v42 = vsel %vm1803_vm7, %v1796_v8, %v2618_v43 }
 0x165   : > { %v2626_v4 = vpop.permute.xlu1 %2625  ;;  %v1845_v53 = vsel %vm1836_vm8, %v1812_v31, %v2622_v9  ;;  %v1846_v51 = vsel %vm1836_vm8, %v1813_v1, %v2623_v24 }
 0x166   : > { %v2628_v60 = vunpack.i.h.bf16 %v2626_v4  ;;  %v2627_v56 = vunpack.i.l.bf16 %v2626_v4  ;;  %v2631_v28 = vpop.permute.xlu0 %2630  ;;  %v1878_v23 = vpack.c.bf16 %v1846_v51, %v1845_v53 }
 0x167   : > { %v2633_v54 = vunpack.i.h.bf16 %v2631_v28  ;;  %v2632_v37 = vunpack.i.l.bf16 %v2631_v28 }
 0x168   : > { %v1861_v45 = vsel %vm1836_vm8, %v1828_v32, %v2627_v56  ;;  %v1862_v14 = vsel %vm1836_vm8, %v1829_v42, %v2628_v60  ;;  %v1945_v10 = vsel %vm1928_vm9, %v1878_v23, 0 }
 0x169   : > { %v1886_v48 = vpack.c.bf16 %v1862_v14, %v1861_v45  ;;  %v2636_v58 = vpop.permute.xlu1 %2635  ;;  %v1716_v26 = vsel %vm1704_vm4, %v3384_v25, %v2633_v54  ;;  %v1715_v39 = vsel %vm1704_vm4, %v3381_v16, %v2632_v37 }
 0x16a   : > { %v2641_v5 = vpop.permute.xlu0 %2640  ;;  %v2637_v30 = vunpack.i.l.bf16 %v2636_v58  ;;  %v2638_v6 = vunpack.i.h.bf16 %v2636_v58 }
 0x16b   : > { %2117 = vmatprep.subr.msk.bf16.mxu0 %vm1928_vm9, %v1886_v48  ;;  %v2643_v20 = vunpack.i.h.bf16 %v2641_v5  ;;  %v2642_v7 = vunpack.i.l.bf16 %v2641_v5 }
 0x16c   : > { %2104 = vmatpush3.bf16.xpose.msra.mxu0 %v1945_v10  ;;  %v1731_v46 = vsel %vm1704_vm4, %v3473_v63, %v2637_v30  ;;  %v1732_v9 = vsel %vm1704_vm4, %v3476_v36, %v2638_v6 }
 0x16d   : > { %v2646_v22 = vpop.permute.xlu1 %2645  ;;  %v1748_v33 = vsel %vm1737_vm5, %v1715_v39, %v2642_v7  ;;  %v1749_v13 = vsel %vm1737_vm5, %v1716_v26, %v2643_v20 }
 0x16e   : > { %v2651_v19 = vpop.permute.xlu0 %2650  ;;  %v2647_v62 = vunpack.i.l.bf16 %v2646_v22  ;;  %v2648_v52 = vunpack.i.h.bf16 %v2646_v22 }
 0x16f   : > { %v2653_v29 = vunpack.i.h.bf16 %v2651_v19  ;;  %v2652_v15 = vunpack.i.l.bf16 %v2651_v19 }
 0x170   : > { %v1764_v41 = vsel %vm1737_vm5, %v1731_v46, %v2647_v62  ;;  %v1765_v63 = vsel %vm1737_vm5, %v1732_v9, %v2648_v52 }
 0x171   : > { %v2656_v50 = vpop.permute.xlu1 %2655  ;;  %v1781_v27 = vsel %vm1770_vm6, %v1748_v33, %v2652_v15  ;;  %v1782_v25 = vsel %vm1770_vm6, %v1749_v13, %v2653_v29 }
 0x172   : > { %v2661_v59 = vpop.permute.xlu0 %2660  ;;  %v2657_v55 = vunpack.i.l.bf16 %v2656_v50  ;;  %v2658_v18 = vunpack.i.h.bf16 %v2656_v50 }
 0x173   : > { %v2663_v12 = vunpack.i.h.bf16 %v2661_v59  ;;  %v2662_v40 = vunpack.i.l.bf16 %v2661_v59 }
 0x174   : > { %v1797_v1 = vsel %vm1770_vm6, %v1764_v41, %v2657_v55  ;;  %v1798_v53 = vsel %vm1770_vm6, %v1765_v63, %v2658_v18 }
 0x175   : > { %v2666_v34 = vpop.permute.xlu1 %2665  ;;  %v1814_v38 = vsel %vm1803_vm7, %v1781_v27, %v2662_v40  ;;  %v1815_v31 = vsel %vm1803_vm7, %v1782_v25, %v2663_v12 }
 0x176   : > { %v2671_v16 = vpop.permute.xlu0 %2670  ;;  %v2668_v47 = vunpack.i.h.bf16 %v2666_v34  ;;  %v2667_v43 = vunpack.i.l.bf16 %v2666_v34 }
 0x177   : > { %v2673_v61 = vunpack.i.h.bf16 %v2671_v16  ;;  %v2672_v24 = vunpack.i.l.bf16 %v2671_v16 }
 0x178   : > { %v1830_v56 = vsel %vm1803_vm7, %v1797_v1, %v2667_v43  ;;  %v1831_v28 = vsel %vm1803_vm7, %v1798_v53, %v2668_v47 }
 0x179   : > { %v2676_v0 = vpop.permute.xlu1 %2675  ;;  %v1847_v2 = vsel %vm1836_vm8, %v1814_v38, %v2672_v24  ;;  %v1848_v4 = vsel %vm1836_vm8, %v1815_v31, %v2673_v61 }
 0x17a   : > { %v2678_v51 = vunpack.i.h.bf16 %v2676_v0  ;;  %v2677_v8 = vunpack.i.l.bf16 %v2676_v0  ;;  %v2681_v36 = vpop.permute.xlu0 %2680  ;;  %v1879_v60 = vpack.c.bf16 %v1848_v4, %v1847_v2 }
 0x17b   : > { %v2683_v10 = vunpack.i.h.bf16 %v2681_v36  ;;  %v2682_v22 = vunpack.i.l.bf16 %v2681_v36 }
 0x17c   : > { %v1863_v23 = vsel %vm1836_vm8, %v1830_v56, %v2677_v8  ;;  %v1864_v32 = vsel %vm1836_vm8, %v1831_v28, %v2678_v51  ;;  %v1948_v48 = vsel %vm1928_vm9, %v1879_v60, 0 }
 0x17d   : > { %v1887_v42 = vpack.c.bf16 %v1864_v32, %v1863_v23  ;;  %v2686_v45 = vpop.permute.xlu1 %2685  ;;  %v1717_v29 = vsel %vm1704_vm4, %v3389_v49, %v2682_v22  ;;  %v1718_v15 = vsel %vm1704_vm4, %v3392_v35, %v2683_v10 }
 0x17e   : > { %v2691_v14 = vpop.permute.xlu0 %2690  ;;  %v2687_v20 = vunpack.i.l.bf16 %v2686_v45  ;;  %v2688_v59 = vunpack.i.h.bf16 %v2686_v45 }
 0x17f   : > { %2118 = vmatprep.subr.msk.bf16.mxu0 %vm1928_vm9, %v1887_v42  ;;  %v2693_v19 = vunpack.i.h.bf16 %v2691_v14  ;;  %v2692_v54 = vunpack.i.l.bf16 %v2691_v14 }
 0x180   : > { %2106 = vmatpush3.bf16.xpose.msra.mxu0 %v1948_v48  ;;  %v1733_v52 = vsel %vm1704_vm4, %v3481_v44, %v2687_v20  ;;  %v1734_v16 = vsel %vm1704_vm4, %v3484_v11, %v2688_v59 }
 0x181   : > { %v2696_v58 = vpop.permute.xlu1 %2695  ;;  %v1750_v62 = vsel %vm1737_vm5, %v1717_v29, %v2692_v54  ;;  %v1751_v12 = vsel %vm1737_vm5, %v1718_v15, %v2693_v19 }
 0x182   : > { %v2701_v5 = vpop.permute.xlu0 %2700  ;;  %v2697_v26 = vunpack.i.l.bf16 %v2696_v58  ;;  %v2698_v40 = vunpack.i.h.bf16 %v2696_v58 }
 0x183   : > { %v2703_v7 = vunpack.i.h.bf16 %v2701_v5  ;;  %v2702_v50 = vunpack.i.l.bf16 %v2701_v5 }
 0x184   : > { %v1766_v47 = vsel %vm1737_vm5, %v1733_v52, %v2697_v26  ;;  %v1767_v44 = vsel %vm1737_vm5, %v1734_v16, %v2698_v40 }
 0x185   : > { %v2706_v37 = vpop.permute.xlu1 %2705  ;;  %v1783_v55 = vsel %vm1770_vm6, %v1750_v62, %v2702_v50  ;;  %v1784_v49 = vsel %vm1770_vm6, %v1751_v12, %v2703_v7 }
 0x186   : > { %v2711_v30 = vpop.permute.xlu0 %2710  ;;  %v2707_v33 = vunpack.i.l.bf16 %v2706_v37  ;;  %v2708_v34 = vunpack.i.h.bf16 %v2706_v37 }
 0x187   : > { %v2713_v39 = vunpack.i.h.bf16 %v2711_v30  ;;  %v2712_v6 = vunpack.i.l.bf16 %v2711_v30 }
 0x188   : > { %v1799_v24 = vsel %vm1770_vm6, %v1766_v47, %v2707_v33  ;;  %v1800_v31 = vsel %vm1770_vm6, %v1767_v44, %v2708_v34 }
 0x189   : > { %v2716_v13 = vpop.permute.xlu1 %2715  ;;  %v1816_v43 = vsel %vm1803_vm7, %v1783_v55, %v2712_v6  ;;  %v1817_v61 = vsel %vm1803_vm7, %v1784_v49, %v2713_v39 }
 0x18a   : > { %v2721_v35 = vpop.permute.xlu0 %2720  ;;  %v2718_v46 = vunpack.i.h.bf16 %v2716_v13  ;;  %v2717_v27 = vunpack.i.l.bf16 %v2716_v13 }
 0x18b   : > { %v2723_v25 = vunpack.i.h.bf16 %v2721_v35  ;;  %v2722_v18 = vunpack.i.l.bf16 %v2721_v35 }
 0x18c   : > { %v1832_v2 = vsel %vm1803_vm7, %v1799_v24, %v2717_v27  ;;  %v1833_v4 = vsel %vm1803_vm7, %v1800_v31, %v2718_v46 }
 0x18d   : > { %v2726_v9 = vpop.permute.xlu1 %2725  ;;  %v1849_v41 = vsel %vm1836_vm8, %v1816_v43, %v2722_v18  ;;  %v1850_v38 = vsel %vm1836_vm8, %v1817_v61, %v2723_v25 }
 0x18e   : > { %v2728_v63 = vunpack.i.h.bf16 %v2726_v9  ;;  %v2727_v1 = vunpack.i.l.bf16 %v2726_v9  ;;  %v2731_v11 = vpop.permute.xlu0 %2730  ;;  %v1880_v0 = vpack.c.bf16 %v1850_v38, %v1849_v41 }
 0x18f   : > { %v2733_v32 = vunpack.i.h.bf16 %v2731_v11  ;;  %v2732_v42 = vunpack.i.l.bf16 %v2731_v11 }
 0x190   : > { %v1865_v53 = vsel %vm1836_vm8, %v1832_v2, %v2727_v1  ;;  %v1866_v51 = vsel %vm1836_vm8, %v1833_v4, %v2728_v63  ;;  %v1951_v56 = vsel %vm1928_vm9, %v1880_v0, 0 }
 0x191   : > { %v1888_v8 = vpack.c.bf16 %v1866_v51, %v1865_v53  ;;  %v2736_v36 = vpop.permute.xlu1 %2735  ;;  %v1720_v19 = vsel %vm1704_vm4, %v3408_v17, %v2733_v32  ;;  %v1719_v54 = vsel %vm1704_vm4, %v3405_v21, %v2732_v42 }
 0x192   : > { %v2741_v60 = vpop.permute.xlu0 %2740  ;;  %v2737_v58 = vunpack.i.l.bf16 %v2736_v36  ;;  %v2738_v37 = vunpack.i.h.bf16 %v2736_v36 }
 0x193   : > { %2119 = vmatprep.subr.msk.bf16.mxu0 %vm1928_vm9, %v1888_v8  ;;  %v2743_v45 = vunpack.i.h.bf16 %v2741_v60  ;;  %v2742_v14 = vunpack.i.l.bf16 %v2741_v60 }
 0x194   : > { %2108 = vmatpush3.bf16.xpose.msra.mxu0 %v1951_v56  ;;  %v1735_v39 = vsel %vm1704_vm4, %v3505_v3, %v2737_v58  ;;  %v1736_v52 = vsel %vm1704_vm4, %v3508_v57, %v2738_v37 }
 0x195   : > { %v2746_v28 = vpop.permute.xlu1 %2745  ;;  %v1752_v30 = vsel %vm1737_vm5, %v1719_v54, %v2742_v14  ;;  %v1753_v29 = vsel %vm1737_vm5, %v1720_v19, %v2743_v45 }
 0x196   : > { %v2751_v23 = vpop.permute.xlu0 %2750  ;;  %v2747_v20 = vunpack.i.l.bf16 %v2746_v28  ;;  %v2748_v15 = vunpack.i.h.bf16 %v2746_v28 }
 0x197   : > { %v2753_v5 = vunpack.i.h.bf16 %v2751_v23  ;;  %v2752_v10 = vunpack.i.l.bf16 %v2751_v23 }
 0x198   : > { %v1768_v55 = vsel %vm1737_vm5, %v1735_v39, %v2747_v20  ;;  %v1769_v3 = vsel %vm1737_vm5, %v1736_v52, %v2748_v15 }
 0x199   : > { %v2756_v48 = vpop.permute.xlu1 %2755  ;;  %v1785_v6 = vsel %vm1770_vm6, %v1752_v30, %v2752_v10  ;;  %v1786_v17 = vsel %vm1770_vm6, %v1753_v29, %v2753_v5 }
 0x19a   : > { %v2761_v22 = vpop.permute.xlu0 %2760  ;;  %v2757_v59 = vunpack.i.l.bf16 %v2756_v48  ;;  %v2758_v62 = vunpack.i.h.bf16 %v2756_v48 }
 0x19b   : > { %v2763_v7 = vunpack.i.h.bf16 %v2761_v22  ;;  %v2762_v50 = vunpack.i.l.bf16 %v2761_v22 }
 0x19c   : > { %v1801_v35 = vsel %vm1770_vm6, %v1768_v55, %v2757_v59  ;;  %v1802_v18 = vsel %vm1770_vm6, %v1769_v3, %v2758_v62 }
 0x19d   : > { %v2766_v26 = vpop.permute.xlu1 %2765  ;;  %v1818_v49 = vsel %vm1803_vm7, %v1785_v6, %v2762_v50  ;;  %v1819_v34 = vsel %vm1803_vm7, %v1786_v17, %v2763_v7 }
 0x19e   : > { %v2771_v21 = vpop.permute.xlu0 %2770  ;;  %v2768_v12 = vunpack.i.h.bf16 %v2766_v26  ;;  %v2767_v40 = vunpack.i.l.bf16 %v2766_v26 }
 0x19f   : > { %v2773_v33 = vunpack.i.h.bf16 %v2771_v21  ;;  %v2772_v13 = vunpack.i.l.bf16 %v2771_v21 }
 0x1a0   : > { %v1834_v43 = vsel %vm1803_vm7, %v1801_v35, %v2767_v40  ;;  %v1835_v61 = vsel %vm1803_vm7, %v1802_v18, %v2768_v12 }
 0x1a1   : > { %v2776_v46 = vpop.permute.xlu1 %2775  ;;  %v1851_v27 = vsel %vm1836_vm8, %v1818_v49, %v2772_v13  ;;  %v1852_v25 = vsel %vm1836_vm8, %v1819_v34, %v2773_v33 }
 0x1a2   : > { %v2778_v16 = vunpack.i.h.bf16 %v2776_v46  ;;  %v2777_v57 = vunpack.i.l.bf16 %v2776_v46  ;;  %v1881_v47 = vpack.c.bf16 %v1852_v25, %v1851_v27 }
 0x1a4   : > { %v1867_v44 = vsel %vm1836_vm8, %v1834_v43, %v2777_v57  ;;  %v1868_v24 = vsel %vm1836_vm8, %v1835_v61, %v2778_v16  ;;  %v1954_v41 = vsel %vm1928_vm9, %v1881_v47, 0 }
 0x1a5   : > { %v1889_v9 = vpack.c.bf16 %v1868_v24, %v1867_v44 }
 0x1a7   : > { %2120 = vmatprep.subr.msk.bf16.mxu0 %vm1928_vm9, %v1889_v9 }
 0x1a8   : > { %2110 = vmatpush3.bf16.xpose.msra.mxu0 %v1954_v41 }
 0x1b0   : > { %v1920_v38 = vpop.trf.xlu0 }
 0x1b1   : > { %2111 = vmatprep.mubr.msk.bf16.mxu0 %vm1928_vm9, %v1920_v38 }
 0x1b2   : > { %2112 = vmatmul.mubr.msk.bf16.vlgmr.msra.gmra.mrb[0].mxu0 %vm1928_vm9, %v1920_v38  ;;  %v1894_v31 = vpop.permute.xlu1 %1893 }
 0x285   : > { %v2014_v63 = vpop.f32.mrb[0].mxu0 }
 0x286   : > { %v2015_v1 = vadd.f32 %v2014_v63, %v1894_v31  ;;  %v2016_v11 = vpop.f32.mrb[1].mxu0 }
 0x287   : > { %v2017_v0 = vadd.f32 %v2016_v11, %v1894_v31  ;;  %v2018_v2 = vpop.f32.mrb[2].mxu0 }
 0x288   : > { %2021 = vst [vmem:[%s170_s11] sm:$0xff] %v2015_v1  ;;  %v2019_v4 = vpop.f32.mrb[3].mxu0 }
 0x289   : > { %2022 = vst [vmem:[%s170_s11 + $0x8] sm:$0xff] %v2017_v0 }
 0x28a PF: > { %s13_s12 = sadd.s32 1, %s2798_s12  }
 0x28b   : > { %p10_p4 = scmp.ge.s32.totalorder %s13_s12, 4  }
 0x28d   :  { %12 = sbr.rel (!%p10_p4) target bundleno = 1 (0x1), region = 64 }

</bundles_post_ra>
